<compile_context>
chip_gen: v5e
topology: v5e:2x2
jax: 0.10.0
libtpu: 0.0.40
codegen_flags: <defaults>
</compile_context>

<pallas_src>
import math
from functools import partial

import jax
import jax.numpy as jnp
from jax.experimental import pallas as pl
from jax.experimental.pallas import tpu as pltpu

# bf16 operands, f32 accumulation (preferred_element_type) for all large matmuls.
MATMUL_DTYPE = jnp.bfloat16


# ------------------------- in-kernel helpers -------------------------

def _layernorm(x, g, b, eps):
    # PyTorch nn.LayerNorm: biased variance, eps inside the rsqrt.
    mu = jnp.mean(x, axis=-1, keepdims=True)
    var = jnp.mean((x - mu) ** 2, axis=-1, keepdims=True)
    return (x - mu) * jax.lax.rsqrt(var + eps) * g + b


def _gelu_exact(x):
    # nn.GELU() default = exact (erf-based) GELU.
    return 0.5 * x * (1.0 + jax.lax.erf(x * (1.0 / math.sqrt(2.0))))


def _matmul(a, b):
    # MXU matmul: bf16 operands (weights already stored bf16), f32 accumulation.
    return jnp.dot(a.astype(MATMUL_DTYPE), b.astype(MATMUL_DTYPE),
                   preferred_element_type=jnp.float32)


# ------------------------- fused whole-model kernel -------------------------

def fused_transformer_kernel(
        # HBM-resident embedding (copied into VMEM only at layer 0)
        x_emb_hbm,
        # grid-invariant (VMEM-resident) small params
        embg_ref, embb_ref, clfw_ref, clfb_ref,
        # per-layer stacked weights (layer axis squeezed away by BlockSpec)
        ln1g_ref, ln1b_ref, wqkv_ref, bqkv_ref, wo_ref, bo_ref,
        ln2g_ref, ln2b_ref, w1_ref, b1_ref, w2_ref, b2_ref,
        # output
        logits_ref,
        # scratch: activation + attention context, resident across the layer axis
        x_sc, ctx_sc,
        *, bb, S, nh, dh, eps_emb, eps_layer):
    b = pl.program_id(0)          # batch block (parallel)
    l = pl.program_id(1)          # layer (sequential)
    H = nh * dh
    rows = bb * S

    # ---- layer 0: pull this batch block's embeddings from HBM, LayerNorm(1e-12) ----
    @pl.when(l == 0)
    def _():
        start = pl.multiple_of(b * rows, rows)
        pltpu.sync_copy(x_emb_hbm.at[pl.ds(start, rows), :], x_sc)
        x_sc[...] = _layernorm(x_sc[...], embg_ref[...], embb_ref[...], eps_emb)
        # dropout = identity at inference

    x = x_sc[...]                                        # (rows, H) f32

    # ---- multi-head self-attention on layer_norm1(x) (no mask in reference) ----
    h = _layernorm(x, ln1g_ref[...], ln1b_ref[...], eps_layer)
    # fused QKV projection: one lane-dense matmul + one bias add (bf16 weights).
    qkv = _matmul(h, wqkv_ref[...]) + bqkv_ref[...]      # (rows, 3H) f32
    scale = 1.0 / math.sqrt(dh)

    # Per-head SxS score/context matmuls; head contexts written straight into the
    # context scratch (no lane-axis concatenate).
    for hd in range(nh):
        q_h = qkv[:, hd * dh:(hd + 1) * dh].reshape(bb, S, dh)
        k_h = qkv[:, H + hd * dh:H + (hd + 1) * dh].reshape(bb, S, dh)
        v_h = qkv[:, 2 * H + hd * dh:2 * H + (hd + 1) * dh].reshape(bb, S, dh)
        s_h = jnp.einsum('bqd,bkd->bqk',
                         q_h.astype(MATMUL_DTYPE), k_h.astype(MATMUL_DTYPE),
                         preferred_element_type=jnp.float32) * scale
        s_h = s_h - jnp.max(s_h, axis=-1, keepdims=True)        # softmax(dim=-1)
        p_h = jnp.exp(s_h)
        p_h = p_h * pl.reciprocal(jnp.sum(p_h, axis=-1, keepdims=True),
                                  approx=True)
        c_h = jnp.einsum('bqk,bkd->bqd',
                         p_h.astype(MATMUL_DTYPE), v_h.astype(MATMUL_DTYPE),
                         preferred_element_type=jnp.float32)
        ctx_sc[:, hd * dh:(hd + 1) * dh] = c_h.reshape(rows, dh)

    x = x + _matmul(ctx_sc[...], wo_ref[...]) + bo_ref[...]     # residual add

    # ---- feed-forward on layer_norm2(x) ----
    h = _layernorm(x, ln2g_ref[...], ln2b_ref[...], eps_layer)
    f = _matmul(h, w1_ref[...]) + b1_ref[...]
    f = _gelu_exact(f)
    x = x + _matmul(f, w2_ref[...]) + b2_ref[...]               # residual add
    x_sc[...] = x

    # ---- last layer: classifier on token 0 of each sequence (exact f32) ----
    @pl.when(l == pl.num_programs(1) - 1)
    def _():
        cls_tok = x.reshape(bb, S, H)[:, 0:1, :].reshape(bb, H)  # x[:, 0, :]
        logits = jnp.dot(cls_tok, clfw_ref[...],
                         preferred_element_type=jnp.float32) + clfb_ref[...]
        logits_ref[...] = logits[None]                           # (1, bb, C)


# ------------------------- wrapper -------------------------

def transformer_for_sequence_classification(params, input_ids, cfg,
                                             batch_blocks=None):
    B, S = input_ids.shape
    H = cfg['hidden_size']
    I = cfg['intermediate_size']
    nh = cfg['num_attention_heads']
    dh = H // nh
    L = cfg['num_hidden_layers']
    C = cfg['num_class']

    # Batch-block ("megacore") axis: 2 blocks when possible -> both TCs on v7x.
    NB = batch_blocks if batch_blocks is not None else (2 if B % 2 == 0 else 1)
    assert B % NB == 0
    bb = B // NB
    rows = bb * S

    # Embedding lookups (gather) are glue done in plain JAX; LayerNorm happens
    # inside the fused kernel at layer step 0. Dropout = identity (eval).
    tok = params['token_emb'][input_ids]                 # (B, S, H)
    pos = params['pos_emb'][:S][None, :, :]              # (1, S, H)
    x_emb = (tok + pos).astype(jnp.float32).reshape(B * S, H)

    # Large per-layer matmul weights streamed as bf16.
    wqkv = params['w_qkv'].astype(MATMUL_DTYPE)
    wo = params['wo'].astype(MATMUL_DTYPE)
    w1 = params['w1'].astype(MATMUL_DTYPE)
    w2 = params['w2'].astype(MATMUL_DTYPE)

    def resident(shape):
        # same block index every grid step -> DMA'd once, stays in VMEM
        n = len(shape)
        return pl.BlockSpec(shape, lambda bbi, li, _n=n: (0,) * _n)

    def per_layer(shape):
        # stacked (L, ...) weights: layer dim squeezed; pipelined over the layer axis
        n = len(shape)
        return pl.BlockSpec((pl.Squeezed(),) + shape,
                            lambda bbi, li, _n=n: (li,) + (0,) * _n)

    in_specs = [
        pl.BlockSpec(memory_space=pl.ANY),   # x_emb stays in HBM; copied at l==0
        resident((1, H)),                    # emb_ln_g
        resident((1, H)),                    # emb_ln_b
        resident((H, C)),                    # clf_w
        resident((1, C)),                    # clf_b
        per_layer((1, H)),                   # ln1_g
        per_layer((1, H)),                   # ln1_b
        per_layer((H, 3 * H)),               # w_qkv (bf16)
        per_layer((1, 3 * H)),               # b_qkv
        per_layer((H, H)),                   # wo    (bf16)
        per_layer((1, H)),                   # bo
        per_layer((1, H)),                   # ln2_g
        per_layer((1, H)),                   # ln2_b
        per_layer((H, I)),                   # w1    (bf16)
        per_layer((1, I)),                   # b1
        per_layer((I, H)),                   # w2    (bf16)
        per_layer((1, H)),                   # b2
    ]

    # Explicit VMEM budget: double-buffered per-layer weights + scratch + residents.
    wbytes = jnp.dtype(MATMUL_DTYPE).itemsize
    per_layer_bytes = (H * 3 * H + H * H + H * I + I * H) * wbytes \
        + (4 * H + 3 * H + H + I + H) * 4
    scratch_bytes = 2 * rows * H * 4
    resident_bytes = (2 * H + H * C + C) * 4
    vmem_limit = int(1.5 * (2 * per_layer_bytes + scratch_bytes + resident_bytes)) \
        + (16 << 20)
    vmem_limit = min(vmem_limit, 96 << 20)

    kernel = partial(fused_transformer_kernel, bb=bb, S=S, nh=nh, dh=dh,
                     eps_emb=1e-12, eps_layer=1e-5)

    out = pl.pallas_call(
        kernel,
        out_shape=jax.ShapeDtypeStruct((NB, bb, C), jnp.float32),
        grid_spec=pltpu.PrefetchScalarGridSpec(
            num_scalar_prefetch=0,
            grid=(NB, L),
            in_specs=in_specs,
            out_specs=pl.BlockSpec((1, bb, C), lambda bbi, li: (bbi, 0, 0)),
            scratch_shapes=[pltpu.VMEM((rows, H), jnp.float32),   # x_sc
                            pltpu.VMEM((rows, H), jnp.float32)],  # ctx_sc
        ),
        compiler_params=pltpu.CompilerParams(
            dimension_semantics=("parallel", "arbitrary"),  # batch blocks || layers seq
            vmem_limit_bytes=vmem_limit),
    )(x_emb, params['emb_ln_g'], params['emb_ln_b'],
      params['clf_w'], params['clf_b'],
      params['ln1_g'], params['ln1_b'],
      wqkv, params['b_qkv'],
      wo, params['bo'],
      params['ln2_g'], params['ln2_b'],
      w1, params['b1'],
      w2, params['b2'])

    return out.reshape(B, C)


# ------------------------- params -------------------------

def init_params(key, cfg):
    H = cfg['hidden_size']
    I = cfg['intermediate_size']
    L = cfg['num_hidden_layers']
    C = cfg['num_class']
    std = 0.02
    ks = jax.random.split(key, 8)
    return {
        'token_emb': jax.random.normal(ks[0], (cfg['vocab_size'], H), jnp.float32) * std,
        'pos_emb':   jax.random.normal(ks[1], (cfg['max_position_embeddings'], H), jnp.float32) * std,
        'emb_ln_g':  jnp.ones((1, H), jnp.float32),
        'emb_ln_b':  jnp.zeros((1, H), jnp.float32),
        'clf_w':     jax.random.normal(ks[2], (H, C), jnp.float32) * std,
        'clf_b':     jnp.zeros((1, C), jnp.float32),
        # per-layer weights stacked on a leading layer axis.
        'ln1_g': jnp.ones((L, 1, H), jnp.float32),
        'ln1_b': jnp.zeros((L, 1, H), jnp.float32),
        'ln2_g': jnp.ones((L, 1, H), jnp.float32),
        'ln2_b': jnp.zeros((L, 1, H), jnp.float32),
        # fused QKV weight layout: columns [0:H]=Q, [H:2H]=K, [2H:3H]=V,
        # each block head-major (head, head_dim) to match torch.cat of head outputs.
        # Large matmul weights stored bf16 (streamed as-is into the MXU).
        'w_qkv': (jax.random.normal(ks[3], (L, H, 3 * H), jnp.float32) * std).astype(MATMUL_DTYPE),
        'b_qkv': jnp.zeros((L, 1, 3 * H), jnp.float32),
        'wo': (jax.random.normal(ks[4], (L, H, H), jnp.float32) * std).astype(MATMUL_DTYPE),
        'bo': jnp.zeros((L, 1, H), jnp.float32),
        'w1': (jax.random.normal(ks[5], (L, H, I), jnp.float32) * std).astype(MATMUL_DTYPE),
        'b1': jnp.zeros((L, 1, I), jnp.float32),
        'w2': (jax.random.normal(ks[6], (L, I, H), jnp.float32) * std).astype(MATMUL_DTYPE),
        'b2': jnp.zeros((L, 1, H), jnp.float32),
    }


# ------------------------- main -------------------------

if __name__ == "__main__":
    # Small but layout-friendly demo shapes: H multiple of 128, bb*S multiple of 8.
    cfg = dict(
        vocab_size=100,
        hidden_size=128,
        num_attention_heads=4,
        intermediate_size=256,
        max_position_embeddings=64,
        num_hidden_layers=2,
        num_class=3,
        hidden_dropout_prob=0.1,   # dropout is identity at inference
    )
    batch, seq_len = 2, 8

    key = jax.random.PRNGKey(0)
    k_params, k_ids = jax.random.split(key)
    params = init_params(k_params, cfg)
    input_ids = jax.random.randint(k_ids, (batch, seq_len), 0, cfg['vocab_size'],
                                   dtype=jnp.int32)

    logits = transformer_for_sequence_classification(params, input_ids, cfg)
    logits = jax.block_until_ready(logits)
    assert logits.shape == (batch, cfg['num_class'])
    print("KERNEL_OK")
</pallas_src>

<mosaic_0001>
module attributes {stable_mosaic.version = 11 : i64} {
  func.func @fused_transformer_kernel(%arg0: i32, %arg1: i32, %arg2: memref<16x128xf32, #tpu.memory_space<any>>, %arg3: memref<1x128xf32, #tpu.memory_space<vmem>>, %arg4: memref<1x128xf32, #tpu.memory_space<vmem>>, %arg5: memref<128x3xf32, #tpu.memory_space<vmem>>, %arg6: memref<1x3xf32, #tpu.memory_space<vmem>>, %arg7: memref<1x1x128xf32, #tpu.memory_space<vmem>>, %arg8: memref<1x1x128xf32, #tpu.memory_space<vmem>>, %arg9: memref<1x128x384xbf16, #tpu.memory_space<vmem>>, %arg10: memref<1x1x384xf32, #tpu.memory_space<vmem>>, %arg11: memref<1x128x128xbf16, #tpu.memory_space<vmem>>, %arg12: memref<1x1x128xf32, #tpu.memory_space<vmem>>, %arg13: memref<1x1x128xf32, #tpu.memory_space<vmem>>, %arg14: memref<1x1x128xf32, #tpu.memory_space<vmem>>, %arg15: memref<1x128x256xbf16, #tpu.memory_space<vmem>>, %arg16: memref<1x1x256xf32, #tpu.memory_space<vmem>>, %arg17: memref<1x256x128xbf16, #tpu.memory_space<vmem>>, %arg18: memref<1x1x128xf32, #tpu.memory_space<vmem>>, %arg19: memref<1x1x3xf32, #tpu.memory_space<vmem>>, %arg20: memref<8x128xf32, #tpu.memory_space<vmem>>, %arg21: memref<8x128xf32, #tpu.memory_space<vmem>>) attributes {dimension_semantics = [#tpu.dimension_semantics<parallel>, #tpu.dimension_semantics<arbitrary>], iteration_bounds = array<i64: 2, 2>, scalar_prefetch = 0 : i64, scratch_operands = 2 : i64, tpu.core_type = #tpu.core_type<tc>, window_params = [{}, {pipeline_mode = #tpu.pipeline_mode<synchronous>, transform_indices = @transform_1, window_bounds = array<i64: 1, 128>}, {pipeline_mode = #tpu.pipeline_mode<synchronous>, transform_indices = @transform_2, window_bounds = array<i64: 1, 128>}, {pipeline_mode = #tpu.pipeline_mode<synchronous>, transform_indices = @transform_3, window_bounds = array<i64: 128, 3>}, {pipeline_mode = #tpu.pipeline_mode<synchronous>, transform_indices = @transform_4, window_bounds = array<i64: 1, 3>}, {transform_indices = @transform_5, window_bounds = array<i64: 1, 1, 128>}, {transform_indices = @transform_6, window_bounds = array<i64: 1, 1, 128>}, {transform_indices = @transform_7, window_bounds = array<i64: 1, 128, 384>}, {transform_indices = @transform_8, window_bounds = array<i64: 1, 1, 384>}, {transform_indices = @transform_9, window_bounds = array<i64: 1, 128, 128>}, {transform_indices = @transform_10, window_bounds = array<i64: 1, 1, 128>}, {transform_indices = @transform_11, window_bounds = array<i64: 1, 1, 128>}, {transform_indices = @transform_12, window_bounds = array<i64: 1, 1, 128>}, {transform_indices = @transform_13, window_bounds = array<i64: 1, 128, 256>}, {transform_indices = @transform_14, window_bounds = array<i64: 1, 1, 256>}, {transform_indices = @transform_15, window_bounds = array<i64: 1, 256, 128>}, {transform_indices = @transform_16, window_bounds = array<i64: 1, 1, 128>}, {transform_indices = @transform_17, window_bounds = array<i64: 1, 1, 3>}]} {
    %c0_i32 = arith.constant 0 : i32
    %0 = arith.cmpi eq, %arg1, %c0_i32 : i32
    %1 = arith.extui %0 : i1 to i32
    %c0_i32_0 = arith.constant 0 : i32
    %2 = arith.cmpi ne, %1, %c0_i32_0 : i32
    scf.if %2 {
      %c8_i32 = arith.constant 8 : i32
      %207 = arith.muli %arg0, %c8_i32 : i32
      %208 = tpu.assume_multiple %207, 8 : i32
      "tpu.region"() ({
        %235 = tpu.sem_alloc : memref<!tpu.dma_semaphore, #tpu.memory_space<semaphore_mem>>
        %c0_i32_97 = arith.constant 0 : i32
        %236 = tpu.memref_slice %arg2[%208, %c0_i32_97] : memref<16x128xf32, #tpu.memory_space<any>> -> memref<8x128xf32, #tpu.memory_space<any>>
        tpu.enqueue_dma source(%236 : memref<8x128xf32, #tpu.memory_space<any>>) target(%arg20 : memref<8x128xf32, #tpu.memory_space<vmem>>) target_semaphore(%235 : memref<!tpu.dma_semaphore, #tpu.memory_space<semaphore_mem>>)
        %c0_i32_98 = arith.constant 0 : i32
        %237 = tpu.memref_slice %arg2[%208, %c0_i32_98] : memref<16x128xf32, #tpu.memory_space<any>> -> memref<8x128xf32, #tpu.memory_space<any>>
        tpu.wait_dma2 semaphore(%235 : memref<!tpu.dma_semaphore, #tpu.memory_space<semaphore_mem>>) src(%237 : memref<8x128xf32, #tpu.memory_space<any>>) dst(%arg20 : memref<8x128xf32, #tpu.memory_space<vmem>>)
        tpu.yield
      }) : () -> ()
      %c0_84 = arith.constant 0 : index
      %c0_85 = arith.constant 0 : index
      %209 = vector.load %arg20[%c0_84, %c0_85] : memref<8x128xf32, #tpu.memory_space<vmem>>, vector<8x128xf32>
      %c0_86 = arith.constant 0 : index
      %c0_87 = arith.constant 0 : index
      %210 = vector.load %arg3[%c0_86, %c0_87] : memref<1x128xf32, #tpu.memory_space<vmem>>, vector<1x128xf32>
      %c0_88 = arith.constant 0 : index
      %c0_89 = arith.constant 0 : index
      %211 = vector.load %arg4[%c0_88, %c0_89] : memref<1x128xf32, #tpu.memory_space<vmem>>, vector<1x128xf32>
      %cst_90 = arith.constant dense<0.000000e+00> : vector<8xf32>
      %212 = vector.multi_reduction <add>, %209, %cst_90 [1] : vector<8x128xf32> to vector<8xf32>
      %213 = vector.shape_cast %212 : vector<8xf32> to vector<8x1xf32>
      %cst_91 = arith.constant 1.280000e+02 : f32
      %214 = vector.broadcast %cst_91 : f32 to vector<8x1xf32>
      %215 = arith.divf %213, %214 : vector<8x1xf32>
      %216 = vector.broadcast %215 : vector<8x1xf32> to vector<8x128xf32>
      %217 = arith.subf %209, %216 : vector<8x128xf32>
      %218 = arith.mulf %217, %217 : vector<8x128xf32>
      %cst_92 = arith.constant dense<0.000000e+00> : vector<8xf32>
      %219 = vector.multi_reduction <add>, %218, %cst_92 [1] : vector<8x128xf32> to vector<8xf32>
      %220 = vector.shape_cast %219 : vector<8xf32> to vector<8x1xf32>
      %cst_93 = arith.constant 1.280000e+02 : f32
      %221 = vector.broadcast %cst_93 : f32 to vector<8x1xf32>
      %222 = arith.divf %220, %221 : vector<8x1xf32>
      %223 = vector.broadcast %215 : vector<8x1xf32> to vector<8x128xf32>
      %224 = arith.subf %209, %223 : vector<8x128xf32>
      %cst_94 = arith.constant 9.99999996E-13 : f32
      %225 = vector.broadcast %cst_94 : f32 to vector<8x1xf32>
      %226 = arith.addf %222, %225 : vector<8x1xf32>
      %227 = math.rsqrt %226 : vector<8x1xf32>
      %228 = vector.broadcast %227 : vector<8x1xf32> to vector<8x128xf32>
      %229 = arith.mulf %224, %228 : vector<8x128xf32>
      %230 = vector.broadcast %210 : vector<1x128xf32> to vector<8x128xf32>
      %231 = arith.mulf %229, %230 : vector<8x128xf32>
      %232 = vector.broadcast %211 : vector<1x128xf32> to vector<8x128xf32>
      %233 = arith.addf %231, %232 : vector<8x128xf32>
      %c0_95 = arith.constant 0 : index
      %c0_96 = arith.constant 0 : index
      %234 = vector.load %arg20[%c0_95, %c0_96] : memref<8x128xf32, #tpu.memory_space<vmem>>, vector<8x128xf32>
      tpu.vector_store %arg20[%c0_95, %c0_96], %233 {strides = array<i32>} : memref<8x128xf32, #tpu.memory_space<vmem>>, vector<8x128xf32>,
    } else {
    }
    %c0 = arith.constant 0 : index
    %c0_1 = arith.constant 0 : index
    %3 = vector.load %arg20[%c0, %c0_1] : memref<8x128xf32, #tpu.memory_space<vmem>>, vector<8x128xf32>
    %c0_2 = arith.constant 0 : index
    %c0_3 = arith.constant 0 : index
    %c0_4 = arith.constant 0 : index
    %4 = vector.load %arg7[%c0_2, %c0_3, %c0_4] : memref<1x1x128xf32, #tpu.memory_space<vmem>>, vector<1x1x128xf32>
    %5 = vector.shape_cast %4 : vector<1x1x128xf32> to vector<1x128xf32>
    %c0_5 = arith.constant 0 : index
    %c0_6 = arith.constant 0 : index
    %c0_7 = arith.constant 0 : index
    %6 = vector.load %arg8[%c0_5, %c0_6, %c0_7] : memref<1x1x128xf32, #tpu.memory_space<vmem>>, vector<1x1x128xf32>
    %7 = vector.shape_cast %6 : vector<1x1x128xf32> to vector<1x128xf32>
    %cst = arith.constant dense<0.000000e+00> : vector<8xf32>
    %8 = vector.multi_reduction <add>, %3, %cst [1] : vector<8x128xf32> to vector<8xf32>
    %9 = vector.shape_cast %8 : vector<8xf32> to vector<8x1xf32>
    %cst_8 = arith.constant 1.280000e+02 : f32
    %10 = vector.broadcast %cst_8 : f32 to vector<8x1xf32>
    %11 = arith.divf %9, %10 : vector<8x1xf32>
    %12 = vector.broadcast %11 : vector<8x1xf32> to vector<8x128xf32>
    %13 = arith.subf %3, %12 : vector<8x128xf32>
    %14 = arith.mulf %13, %13 : vector<8x128xf32>
    %cst_9 = arith.constant dense<0.000000e+00> : vector<8xf32>
    %15 = vector.multi_reduction <add>, %14, %cst_9 [1] : vector<8x128xf32> to vector<8xf32>
    %16 = vector.shape_cast %15 : vector<8xf32> to vector<8x1xf32>
    %cst_10 = arith.constant 1.280000e+02 : f32
    %17 = vector.broadcast %cst_10 : f32 to vector<8x1xf32>
    %18 = arith.divf %16, %17 : vector<8x1xf32>
    %19 = vector.broadcast %11 : vector<8x1xf32> to vector<8x128xf32>
    %20 = arith.subf %3, %19 : vector<8x128xf32>
    %cst_11 = arith.constant 9.99999974E-6 : f32
    %21 = vector.broadcast %cst_11 : f32 to vector<8x1xf32>
    %22 = arith.addf %18, %21 : vector<8x1xf32>
    %23 = math.rsqrt %22 : vector<8x1xf32>
    %24 = vector.broadcast %23 : vector<8x1xf32> to vector<8x128xf32>
    %25 = arith.mulf %20, %24 : vector<8x128xf32>
    %26 = vector.broadcast %5 : vector<1x128xf32> to vector<8x128xf32>
    %27 = arith.mulf %25, %26 : vector<8x128xf32>
    %28 = vector.broadcast %7 : vector<1x128xf32> to vector<8x128xf32>
    %29 = arith.addf %27, %28 : vector<8x128xf32>
    %c0_12 = arith.constant 0 : index
    %c0_13 = arith.constant 0 : index
    %c0_14 = arith.constant 0 : index
    %30 = vector.load %arg9[%c0_12, %c0_13, %c0_14] : memref<1x128x384xbf16, #tpu.memory_space<vmem>>, vector<1x128x384xbf16>
    %31 = vector.shape_cast %30 : vector<1x128x384xbf16> to vector<128x384xbf16>
    %32 = arith.truncf %29 : vector<8x128xf32> to vector<8x128xbf16>
    %cst_15 = arith.constant dense<0.000000e+00> : vector<8x384xf32>
    %33 = tpu.matmul %32, %31, %cst_15 {dimension_numbers = #tpu.dot_dimension_numbers<[1], [0], [0], [1], [0, 0, 1, 1], [], []>} : vector<8x128xbf16>, vector<128x384xbf16>, vector<8x384xf32> -> vector<8x384xf32>
    %c0_16 = arith.constant 0 : index
    %c0_17 = arith.constant 0 : index
    %c0_18 = arith.constant 0 : index
    %34 = vector.load %arg10[%c0_16, %c0_17, %c0_18] : memref<1x1x384xf32, #tpu.memory_space<vmem>>, vector<1x1x384xf32>
    %35 = vector.shape_cast %34 : vector<1x1x384xf32> to vector<1x384xf32>
    %36 = vector.broadcast %35 : vector<1x384xf32> to vector<8x384xf32>
    %37 = arith.addf %33, %36 : vector<8x384xf32>
    %38 = vector.extract_strided_slice %37 {offsets = [0, 0], sizes = [8, 32], strides = [1, 1]} : vector<8x384xf32> to vector<8x32xf32>
    %39 = vector.shape_cast %38 : vector<8x32xf32> to vector<1x8x32xf32>
    %40 = vector.extract_strided_slice %37 {offsets = [0, 128], sizes = [8, 32], strides = [1, 1]} : vector<8x384xf32> to vector<8x32xf32>
    %41 = vector.shape_cast %40 : vector<8x32xf32> to vector<1x8x32xf32>
    %42 = vector.extract_strided_slice %37 {offsets = [0, 256], sizes = [8, 32], strides = [1, 1]} : vector<8x384xf32> to vector<8x32xf32>
    %43 = vector.shape_cast %42 : vector<8x32xf32> to vector<1x8x32xf32>
    %44 = arith.truncf %39 : vector<1x8x32xf32> to vector<1x8x32xbf16>
    %45 = arith.truncf %41 : vector<1x8x32xf32> to vector<1x8x32xbf16>
    "tpu.trace_start"() <{level = 10 : i32, message = "bqd,bkd->bqk"}> : () -> ()
    %cst_19 = arith.constant dense<0.000000e+00> : vector<1x8x8xf32>
    %46 = tpu.matmul %44, %45, %cst_19 {dimension_numbers = #tpu.dot_dimension_numbers<[2], [2], [1], [1], [0, 0, 0, 1, 1, 1], [0], [0]>} : vector<1x8x32xbf16>, vector<1x8x32xbf16>, vector<1x8x8xf32> -> vector<1x8x8xf32>
    "tpu.trace_stop"() : () -> ()
    %cst_20 = arith.constant 0.176776692 : f32
    %47 = vector.broadcast %cst_20 : f32 to vector<1x8x8xf32>
    %48 = arith.mulf %46, %47 : vector<1x8x8xf32>
    %cst_21 = arith.constant dense<0xFF800000> : vector<1x8xf32>
    %49 = vector.multi_reduction <maximumf>, %48, %cst_21 [2] : vector<1x8x8xf32> to vector<1x8xf32>
    %50 = vector.shape_cast %49 : vector<1x8xf32> to vector<1x8x1xf32>
    %51 = vector.broadcast %50 : vector<1x8x1xf32> to vector<1x8x8xf32>
    %52 = arith.subf %48, %51 : vector<1x8x8xf32>
    %53 = math.exp %52 : vector<1x8x8xf32>
    %cst_22 = arith.constant dense<0.000000e+00> : vector<1x8xf32>
    %54 = vector.multi_reduction <add>, %53, %cst_22 [2] : vector<1x8x8xf32> to vector<1x8xf32>
    %55 = vector.shape_cast %54 : vector<1x8xf32> to vector<1x8x1xf32>
    %56 = tpu.reciprocal %55 {approx = true} : vector<1x8x1xf32> -> vector<1x8x1xf32>
    %57 = vector.broadcast %56 : vector<1x8x1xf32> to vector<1x8x8xf32>
    %58 = arith.mulf %53, %57 : vector<1x8x8xf32>
    %59 = arith.truncf %58 : vector<1x8x8xf32> to vector<1x8x8xbf16>
    %60 = arith.truncf %43 : vector<1x8x32xf32> to vector<1x8x32xbf16>
    "tpu.trace_start"() <{level = 10 : i32, message = "bqk,bkd->bqd"}> : () -> ()
    %cst_23 = arith.constant dense<0.000000e+00> : vector<1x8x32xf32>
    %61 = tpu.matmul %59, %60, %cst_23 {dimension_numbers = #tpu.dot_dimension_numbers<[2], [1], [1], [2], [0, 0, 0, 1, 1, 2], [0], [0]>} : vector<1x8x8xbf16>, vector<1x8x32xbf16>, vector<1x8x32xf32> -> vector<1x8x32xf32>
    "tpu.trace_stop"() : () -> ()
    %62 = vector.shape_cast %61 : vector<1x8x32xf32> to vector<8x32xf32>
    %c0_24 = arith.constant 0 : index
    %c0_25 = arith.constant 0 : index
    %63 = vector.load %arg21[%c0_24, %c0_25] : memref<8x128xf32, #tpu.memory_space<vmem>>, vector<8x32xf32>
    tpu.vector_store %arg21[%c0_24, %c0_25], %62 {strides = array<i32>} : memref<8x128xf32, #tpu.memory_space<vmem>>, vector<8x32xf32>,
    %64 = vector.extract_strided_slice %37 {offsets = [0, 32], sizes = [8, 32], strides = [1, 1]} : vector<8x384xf32> to vector<8x32xf32>
    %65 = vector.shape_cast %64 : vector<8x32xf32> to vector<1x8x32xf32>
    %66 = vector.extract_strided_slice %37 {offsets = [0, 160], sizes = [8, 32], strides = [1, 1]} : vector<8x384xf32> to vector<8x32xf32>
    %67 = vector.shape_cast %66 : vector<8x32xf32> to vector<1x8x32xf32>
    %68 = vector.extract_strided_slice %37 {offsets = [0, 288], sizes = [8, 32], strides = [1, 1]} : vector<8x384xf32> to vector<8x32xf32>
    %69 = vector.shape_cast %68 : vector<8x32xf32> to vector<1x8x32xf32>
    %70 = arith.truncf %65 : vector<1x8x32xf32> to vector<1x8x32xbf16>
    %71 = arith.truncf %67 : vector<1x8x32xf32> to vector<1x8x32xbf16>
    "tpu.trace_start"() <{level = 10 : i32, message = "bqd,bkd->bqk"}> : () -> ()
    %cst_26 = arith.constant dense<0.000000e+00> : vector<1x8x8xf32>
    %72 = tpu.matmul %70, %71, %cst_26 {dimension_numbers = #tpu.dot_dimension_numbers<[2], [2], [1], [1], [0, 0, 0, 1, 1, 1], [0], [0]>} : vector<1x8x32xbf16>, vector<1x8x32xbf16>, vector<1x8x8xf32> -> vector<1x8x8xf32>
    "tpu.trace_stop"() : () -> ()
    %cst_27 = arith.constant 0.176776692 : f32
    %73 = vector.broadcast %cst_27 : f32 to vector<1x8x8xf32>
    %74 = arith.mulf %72, %73 : vector<1x8x8xf32>
    %cst_28 = arith.constant dense<0xFF800000> : vector<1x8xf32>
    %75 = vector.multi_reduction <maximumf>, %74, %cst_28 [2] : vector<1x8x8xf32> to vector<1x8xf32>
    %76 = vector.shape_cast %75 : vector<1x8xf32> to vector<1x8x1xf32>
    %77 = vector.broadcast %76 : vector<1x8x1xf32> to vector<1x8x8xf32>
    %78 = arith.subf %74, %77 : vector<1x8x8xf32>
    %79 = math.exp %78 : vector<1x8x8xf32>
    %cst_29 = arith.constant dense<0.000000e+00> : vector<1x8xf32>
    %80 = vector.multi_reduction <add>, %79, %cst_29 [2] : vector<1x8x8xf32> to vector<1x8xf32>
    %81 = vector.shape_cast %80 : vector<1x8xf32> to vector<1x8x1xf32>
    %82 = tpu.reciprocal %81 {approx = true} : vector<1x8x1xf32> -> vector<1x8x1xf32>
    %83 = vector.broadcast %82 : vector<1x8x1xf32> to vector<1x8x8xf32>
    %84 = arith.mulf %79, %83 : vector<1x8x8xf32>
    %85 = arith.truncf %84 : vector<1x8x8xf32> to vector<1x8x8xbf16>
    %86 = arith.truncf %69 : vector<1x8x32xf32> to vector<1x8x32xbf16>
    "tpu.trace_start"() <{level = 10 : i32, message = "bqk,bkd->bqd"}> : () -> ()
    %cst_30 = arith.constant dense<0.000000e+00> : vector<1x8x32xf32>
    %87 = tpu.matmul %85, %86, %cst_30 {dimension_numbers = #tpu.dot_dimension_numbers<[2], [1], [1], [2], [0, 0, 0, 1, 1, 2], [0], [0]>} : vector<1x8x8xbf16>, vector<1x8x32xbf16>, vector<1x8x32xf32> -> vector<1x8x32xf32>
    "tpu.trace_stop"() : () -> ()
    %88 = vector.shape_cast %87 : vector<1x8x32xf32> to vector<8x32xf32>
    %c0_31 = arith.constant 0 : index
    %c32 = arith.constant 32 : index
    %89 = vector.load %arg21[%c0_31, %c32] : memref<8x128xf32, #tpu.memory_space<vmem>>, vector<8x32xf32>
    tpu.vector_store %arg21[%c0_31, %c32], %88 {strides = array<i32>} : memref<8x128xf32, #tpu.memory_space<vmem>>, vector<8x32xf32>,
    %90 = vector.extract_strided_slice %37 {offsets = [0, 64], sizes = [8, 32], strides = [1, 1]} : vector<8x384xf32> to vector<8x32xf32>
    %91 = vector.shape_cast %90 : vector<8x32xf32> to vector<1x8x32xf32>
    %92 = vector.extract_strided_slice %37 {offsets = [0, 192], sizes = [8, 32], strides = [1, 1]} : vector<8x384xf32> to vector<8x32xf32>
    %93 = vector.shape_cast %92 : vector<8x32xf32> to vector<1x8x32xf32>
    %94 = vector.extract_strided_slice %37 {offsets = [0, 320], sizes = [8, 32], strides = [1, 1]} : vector<8x384xf32> to vector<8x32xf32>
    %95 = vector.shape_cast %94 : vector<8x32xf32> to vector<1x8x32xf32>
    %96 = arith.truncf %91 : vector<1x8x32xf32> to vector<1x8x32xbf16>
    %97 = arith.truncf %93 : vector<1x8x32xf32> to vector<1x8x32xbf16>
    "tpu.trace_start"() <{level = 10 : i32, message = "bqd,bkd->bqk"}> : () -> ()
    %cst_32 = arith.constant dense<0.000000e+00> : vector<1x8x8xf32>
    %98 = tpu.matmul %96, %97, %cst_32 {dimension_numbers = #tpu.dot_dimension_numbers<[2], [2], [1], [1], [0, 0, 0, 1, 1, 1], [0], [0]>} : vector<1x8x32xbf16>, vector<1x8x32xbf16>, vector<1x8x8xf32> -> vector<1x8x8xf32>
    "tpu.trace_stop"() : () -> ()
    %cst_33 = arith.constant 0.176776692 : f32
    %99 = vector.broadcast %cst_33 : f32 to vector<1x8x8xf32>
    %100 = arith.mulf %98, %99 : vector<1x8x8xf32>
    %cst_34 = arith.constant dense<0xFF800000> : vector<1x8xf32>
    %101 = vector.multi_reduction <maximumf>, %100, %cst_34 [2] : vector<1x8x8xf32> to vector<1x8xf32>
    %102 = vector.shape_cast %101 : vector<1x8xf32> to vector<1x8x1xf32>
    %103 = vector.broadcast %102 : vector<1x8x1xf32> to vector<1x8x8xf32>
    %104 = arith.subf %100, %103 : vector<1x8x8xf32>
    %105 = math.exp %104 : vector<1x8x8xf32>
    %cst_35 = arith.constant dense<0.000000e+00> : vector<1x8xf32>
    %106 = vector.multi_reduction <add>, %105, %cst_35 [2] : vector<1x8x8xf32> to vector<1x8xf32>
    %107 = vector.shape_cast %106 : vector<1x8xf32> to vector<1x8x1xf32>
    %108 = tpu.reciprocal %107 {approx = true} : vector<1x8x1xf32> -> vector<1x8x1xf32>
    %109 = vector.broadcast %108 : vector<1x8x1xf32> to vector<1x8x8xf32>
    %110 = arith.mulf %105, %109 : vector<1x8x8xf32>
    %111 = arith.truncf %110 : vector<1x8x8xf32> to vector<1x8x8xbf16>
    %112 = arith.truncf %95 : vector<1x8x32xf32> to vector<1x8x32xbf16>
    "tpu.trace_start"() <{level = 10 : i32, message = "bqk,bkd->bqd"}> : () -> ()
    %cst_36 = arith.constant dense<0.000000e+00> : vector<1x8x32xf32>
    %113 = tpu.matmul %111, %112, %cst_36 {dimension_numbers = #tpu.dot_dimension_numbers<[2], [1], [1], [2], [0, 0, 0, 1, 1, 2], [0], [0]>} : vector<1x8x8xbf16>, vector<1x8x32xbf16>, vector<1x8x32xf32> -> vector<1x8x32xf32>
    "tpu.trace_stop"() : () -> ()
    %114 = vector.shape_cast %113 : vector<1x8x32xf32> to vector<8x32xf32>
    %c0_37 = arith.constant 0 : index
    %c64 = arith.constant 64 : index
    %115 = vector.load %arg21[%c0_37, %c64] : memref<8x128xf32, #tpu.memory_space<vmem>>, vector<8x32xf32>
    tpu.vector_store %arg21[%c0_37, %c64], %114 {strides = array<i32>} : memref<8x128xf32, #tpu.memory_space<vmem>>, vector<8x32xf32>,
    %116 = vector.extract_strided_slice %37 {offsets = [0, 96], sizes = [8, 32], strides = [1, 1]} : vector<8x384xf32> to vector<8x32xf32>
    %117 = vector.shape_cast %116 : vector<8x32xf32> to vector<1x8x32xf32>
    %118 = vector.extract_strided_slice %37 {offsets = [0, 224], sizes = [8, 32], strides = [1, 1]} : vector<8x384xf32> to vector<8x32xf32>
    %119 = vector.shape_cast %118 : vector<8x32xf32> to vector<1x8x32xf32>
    %120 = vector.extract_strided_slice %37 {offsets = [0, 352], sizes = [8, 32], strides = [1, 1]} : vector<8x384xf32> to vector<8x32xf32>
    %121 = vector.shape_cast %120 : vector<8x32xf32> to vector<1x8x32xf32>
    %122 = arith.truncf %117 : vector<1x8x32xf32> to vector<1x8x32xbf16>
    %123 = arith.truncf %119 : vector<1x8x32xf32> to vector<1x8x32xbf16>
    "tpu.trace_start"() <{level = 10 : i32, message = "bqd,bkd->bqk"}> : () -> ()
    %cst_38 = arith.constant dense<0.000000e+00> : vector<1x8x8xf32>
    %124 = tpu.matmul %122, %123, %cst_38 {dimension_numbers = #tpu.dot_dimension_numbers<[2], [2], [1], [1], [0, 0, 0, 1, 1, 1], [0], [0]>} : vector<1x8x32xbf16>, vector<1x8x32xbf16>, vector<1x8x8xf32> -> vector<1x8x8xf32>
    "tpu.trace_stop"() : () -> ()
    %cst_39 = arith.constant 0.176776692 : f32
    %125 = vector.broadcast %cst_39 : f32 to vector<1x8x8xf32>
    %126 = arith.mulf %124, %125 : vector<1x8x8xf32>
    %cst_40 = arith.constant dense<0xFF800000> : vector<1x8xf32>
    %127 = vector.multi_reduction <maximumf>, %126, %cst_40 [2] : vector<1x8x8xf32> to vector<1x8xf32>
    %128 = vector.shape_cast %127 : vector<1x8xf32> to vector<1x8x1xf32>
    %129 = vector.broadcast %128 : vector<1x8x1xf32> to vector<1x8x8xf32>
    %130 = arith.subf %126, %129 : vector<1x8x8xf32>
    %131 = math.exp %130 : vector<1x8x8xf32>
    %cst_41 = arith.constant dense<0.000000e+00> : vector<1x8xf32>
    %132 = vector.multi_reduction <add>, %131, %cst_41 [2] : vector<1x8x8xf32> to vector<1x8xf32>
    %133 = vector.shape_cast %132 : vector<1x8xf32> to vector<1x8x1xf32>
    %134 = tpu.reciprocal %133 {approx = true} : vector<1x8x1xf32> -> vector<1x8x1xf32>
    %135 = vector.broadcast %134 : vector<1x8x1xf32> to vector<1x8x8xf32>
    %136 = arith.mulf %131, %135 : vector<1x8x8xf32>
    %137 = arith.truncf %136 : vector<1x8x8xf32> to vector<1x8x8xbf16>
    %138 = arith.truncf %121 : vector<1x8x32xf32> to vector<1x8x32xbf16>
    "tpu.trace_start"() <{level = 10 : i32, message = "bqk,bkd->bqd"}> : () -> ()
    %cst_42 = arith.constant dense<0.000000e+00> : vector<1x8x32xf32>
    %139 = tpu.matmul %137, %138, %cst_42 {dimension_numbers = #tpu.dot_dimension_numbers<[2], [1], [1], [2], [0, 0, 0, 1, 1, 2], [0], [0]>} : vector<1x8x8xbf16>, vector<1x8x32xbf16>, vector<1x8x32xf32> -> vector<1x8x32xf32>
    "tpu.trace_stop"() : () -> ()
    %140 = vector.shape_cast %139 : vector<1x8x32xf32> to vector<8x32xf32>
    %c0_43 = arith.constant 0 : index
    %c96 = arith.constant 96 : index
    %141 = vector.load %arg21[%c0_43, %c96] : memref<8x128xf32, #tpu.memory_space<vmem>>, vector<8x32xf32>
    tpu.vector_store %arg21[%c0_43, %c96], %140 {strides = array<i32>} : memref<8x128xf32, #tpu.memory_space<vmem>>, vector<8x32xf32>,
    %c0_44 = arith.constant 0 : index
    %c0_45 = arith.constant 0 : index
    %142 = vector.load %arg21[%c0_44, %c0_45] : memref<8x128xf32, #tpu.memory_space<vmem>>, vector<8x128xf32>
    %c0_46 = arith.constant 0 : index
    %c0_47 = arith.constant 0 : index
    %c0_48 = arith.constant 0 : index
    %143 = vector.load %arg11[%c0_46, %c0_47, %c0_48] : memref<1x128x128xbf16, #tpu.memory_space<vmem>>, vector<1x128x128xbf16>
    %144 = vector.shape_cast %143 : vector<1x128x128xbf16> to vector<128x128xbf16>
    %145 = arith.truncf %142 : vector<8x128xf32> to vector<8x128xbf16>
    %cst_49 = arith.constant dense<0.000000e+00> : vector<8x128xf32>
    %146 = tpu.matmul %145, %144, %cst_49 {dimension_numbers = #tpu.dot_dimension_numbers<[1], [0], [0], [1], [0, 0, 1, 1], [], []>} : vector<8x128xbf16>, vector<128x128xbf16>, vector<8x128xf32> -> vector<8x128xf32>
    %147 = arith.addf %3, %146 : vector<8x128xf32>
    %c0_50 = arith.constant 0 : index
    %c0_51 = arith.constant 0 : index
    %c0_52 = arith.constant 0 : index
    %148 = vector.load %arg12[%c0_50, %c0_51, %c0_52] : memref<1x1x128xf32, #tpu.memory_space<vmem>>, vector<1x1x128xf32>
    %149 = vector.shape_cast %148 : vector<1x1x128xf32> to vector<1x128xf32>
    %150 = vector.broadcast %149 : vector<1x128xf32> to vector<8x128xf32>
    %151 = arith.addf %147, %150 : vector<8x128xf32>
    %c0_53 = arith.constant 0 : index
    %c0_54 = arith.constant 0 : index
    %c0_55 = arith.constant 0 : index
    %152 = vector.load %arg13[%c0_53, %c0_54, %c0_55] : memref<1x1x128xf32, #tpu.memory_space<vmem>>, vector<1x1x128xf32>
    %153 = vector.shape_cast %152 : vector<1x1x128xf32> to vector<1x128xf32>
    %c0_56 = arith.constant 0 : index
    %c0_57 = arith.constant 0 : index
    %c0_58 = arith.constant 0 : index
    %154 = vector.load %arg14[%c0_56, %c0_57, %c0_58] : memref<1x1x128xf32, #tpu.memory_space<vmem>>, vector<1x1x128xf32>
    %155 = vector.shape_cast %154 : vector<1x1x128xf32> to vector<1x128xf32>
    %cst_59 = arith.constant dense<0.000000e+00> : vector<8xf32>
    %156 = vector.multi_reduction <add>, %151, %cst_59 [1] : vector<8x128xf32> to vector<8xf32>
    %157 = vector.shape_cast %156 : vector<8xf32> to vector<8x1xf32>
    %cst_60 = arith.constant 1.280000e+02 : f32
    %158 = vector.broadcast %cst_60 : f32 to vector<8x1xf32>
    %159 = arith.divf %157, %158 : vector<8x1xf32>
    %160 = vector.broadcast %159 : vector<8x1xf32> to vector<8x128xf32>
    %161 = arith.subf %151, %160 : vector<8x128xf32>
    %162 = arith.mulf %161, %161 : vector<8x128xf32>
    %cst_61 = arith.constant dense<0.000000e+00> : vector<8xf32>
    %163 = vector.multi_reduction <add>, %162, %cst_61 [1] : vector<8x128xf32> to vector<8xf32>
    %164 = vector.shape_cast %163 : vector<8xf32> to vector<8x1xf32>
    %cst_62 = arith.constant 1.280000e+02 : f32
    %165 = vector.broadcast %cst_62 : f32 to vector<8x1xf32>
    %166 = arith.divf %164, %165 : vector<8x1xf32>
    %167 = vector.broadcast %159 : vector<8x1xf32> to vector<8x128xf32>
    %168 = arith.subf %151, %167 : vector<8x128xf32>
    %cst_63 = arith.constant 9.99999974E-6 : f32
    %169 = vector.broadcast %cst_63 : f32 to vector<8x1xf32>
    %170 = arith.addf %166, %169 : vector<8x1xf32>
    %171 = math.rsqrt %170 : vector<8x1xf32>
    %172 = vector.broadcast %171 : vector<8x1xf32> to vector<8x128xf32>
    %173 = arith.mulf %168, %172 : vector<8x128xf32>
    %174 = vector.broadcast %153 : vector<1x128xf32> to vector<8x128xf32>
    %175 = arith.mulf %173, %174 : vector<8x128xf32>
    %176 = vector.broadcast %155 : vector<1x128xf32> to vector<8x128xf32>
    %177 = arith.addf %175, %176 : vector<8x128xf32>
    %c0_64 = arith.constant 0 : index
    %c0_65 = arith.constant 0 : index
    %c0_66 = arith.constant 0 : index
    %178 = vector.load %arg15[%c0_64, %c0_65, %c0_66] : memref<1x128x256xbf16, #tpu.memory_space<vmem>>, vector<1x128x256xbf16>
    %179 = vector.shape_cast %178 : vector<1x128x256xbf16> to vector<128x256xbf16>
    %180 = arith.truncf %177 : vector<8x128xf32> to vector<8x128xbf16>
    %cst_67 = arith.constant dense<0.000000e+00> : vector<8x256xf32>
    %181 = tpu.matmul %180, %179, %cst_67 {dimension_numbers = #tpu.dot_dimension_numbers<[1], [0], [0], [1], [0, 0, 1, 1], [], []>} : vector<8x128xbf16>, vector<128x256xbf16>, vector<8x256xf32> -> vector<8x256xf32>
    %c0_68 = arith.constant 0 : index
    %c0_69 = arith.constant 0 : index
    %c0_70 = arith.constant 0 : index
    %182 = vector.load %arg16[%c0_68, %c0_69, %c0_70] : memref<1x1x256xf32, #tpu.memory_space<vmem>>, vector<1x1x256xf32>
    %183 = vector.shape_cast %182 : vector<1x1x256xf32> to vector<1x256xf32>
    %184 = vector.broadcast %183 : vector<1x256xf32> to vector<8x256xf32>
    %185 = arith.addf %181, %184 : vector<8x256xf32>
    %cst_71 = arith.constant 5.000000e-01 : f32
    %186 = vector.broadcast %cst_71 : f32 to vector<8x256xf32>
    %187 = arith.mulf %186, %185 : vector<8x256xf32>
    %cst_72 = arith.constant 0.707106769 : f32
    %188 = vector.broadcast %cst_72 : f32 to vector<8x256xf32>
    %189 = arith.mulf %185, %188 : vector<8x256xf32>
    %190 = math.erf %189 : vector<8x256xf32>
    %cst_73 = arith.constant 1.000000e+00 : f32
    %191 = vector.broadcast %cst_73 : f32 to vector<8x256xf32>
    %192 = arith.addf %191, %190 : vector<8x256xf32>
    %193 = arith.mulf %187, %192 : vector<8x256xf32>
    %c0_74 = arith.constant 0 : index
    %c0_75 = arith.constant 0 : index
    %c0_76 = arith.constant 0 : index
    %194 = vector.load %arg17[%c0_74, %c0_75, %c0_76] : memref<1x256x128xbf16, #tpu.memory_space<vmem>>, vector<1x256x128xbf16>
    %195 = vector.shape_cast %194 : vector<1x256x128xbf16> to vector<256x128xbf16>
    %196 = arith.truncf %193 : vector<8x256xf32> to vector<8x256xbf16>
    %cst_77 = arith.constant dense<0.000000e+00> : vector<8x128xf32>
    %197 = tpu.matmul %196, %195, %cst_77 {dimension_numbers = #tpu.dot_dimension_numbers<[1], [0], [0], [1], [0, 0, 1, 1], [], []>} : vector<8x256xbf16>, vector<256x128xbf16>, vector<8x128xf32> -> vector<8x128xf32>
    %198 = arith.addf %151, %197 : vector<8x128xf32>
    %c0_78 = arith.constant 0 : index
    %c0_79 = arith.constant 0 : index
    %c0_80 = arith.constant 0 : index
    %199 = vector.load %arg18[%c0_78, %c0_79, %c0_80] : memref<1x1x128xf32, #tpu.memory_space<vmem>>, vector<1x1x128xf32>
    %200 = vector.shape_cast %199 : vector<1x1x128xf32> to vector<1x128xf32>
    %201 = vector.broadcast %200 : vector<1x128xf32> to vector<8x128xf32>
    %202 = arith.addf %198, %201 : vector<8x128xf32>
    %c0_81 = arith.constant 0 : index
    %c0_82 = arith.constant 0 : index
    %203 = vector.load %arg20[%c0_81, %c0_82] : memref<8x128xf32, #tpu.memory_space<vmem>>, vector<8x128xf32>
    tpu.vector_store %arg20[%c0_81, %c0_82], %202 {strides = array<i32>} : memref<8x128xf32, #tpu.memory_space<vmem>>, vector<8x128xf32>,
    %c1_i32 = arith.constant 1 : i32
    %204 = arith.cmpi eq, %arg1, %c1_i32 : i32
    %205 = arith.extui %204 : i1 to i32
    %c0_i32_83 = arith.constant 0 : i32
    %206 = arith.cmpi ne, %205, %c0_i32_83 : i32
    scf.if %206 {
      %207 = vector.shape_cast %202 : vector<8x128xf32> to vector<1x8x128xf32>
      %208 = vector.extract_strided_slice %207 {offsets = [0, 0, 0], sizes = [1, 1, 128], strides = [1, 1, 1]} : vector<1x8x128xf32> to vector<1x1x128xf32>
      %209 = vector.shape_cast %208 : vector<1x1x128xf32> to vector<1x128xf32>
      %c0_84 = arith.constant 0 : index
      %c0_85 = arith.constant 0 : index
      %210 = vector.load %arg5[%c0_84, %c0_85] : memref<128x3xf32, #tpu.memory_space<vmem>>, vector<128x3xf32>
      %cst_86 = arith.constant dense<0.000000e+00> : vector<1x3xf32>
      %211 = tpu.matmul %209, %210, %cst_86 {dimension_numbers = #tpu.dot_dimension_numbers<[1], [0], [0], [1], [0, 0, 1, 1], [], []>} : vector<1x128xf32>, vector<128x3xf32>, vector<1x3xf32> -> vector<1x3xf32>
      %c0_87 = arith.constant 0 : index
      %c0_88 = arith.constant 0 : index
      %212 = vector.load %arg6[%c0_87, %c0_88] : memref<1x3xf32, #tpu.memory_space<vmem>>, vector<1x3xf32>
      %213 = arith.addf %211, %212 : vector<1x3xf32>
      %214 = vector.shape_cast %213 : vector<1x3xf32> to vector<1x1x3xf32>
      %c0_89 = arith.constant 0 : index
      %c0_90 = arith.constant 0 : index
      %c0_91 = arith.constant 0 : index
      %215 = vector.load %arg19[%c0_89, %c0_90, %c0_91] : memref<1x1x3xf32, #tpu.memory_space<vmem>>, vector<1x1x3xf32>
      tpu.vector_store %arg19[%c0_89, %c0_90, %c0_91], %214 {strides = array<i32>} : memref<1x1x3xf32, #tpu.memory_space<vmem>>, vector<1x1x3xf32>,
    } else {
    }
    return
  }
  func.func @transform_1(%arg0: i32, %arg1: i32) -> (i32, i32) {
    %c0_i32 = arith.constant 0 : i32
    %c0_i32_0 = arith.constant 0 : i32
    %c0_i32_1 = arith.constant 0 : i32
    return %c0_i32, %c0_i32_0 : i32, i32
  }
  func.func @transform_2(%arg0: i32, %arg1: i32) -> (i32, i32) {
    %c0_i32 = arith.constant 0 : i32
    %c0_i32_0 = arith.constant 0 : i32
    %c0_i32_1 = arith.constant 0 : i32
    return %c0_i32, %c0_i32_0 : i32, i32
  }
  func.func @transform_3(%arg0: i32, %arg1: i32) -> (i32, i32) {
    %c0_i32 = arith.constant 0 : i32
    %c0_i32_0 = arith.constant 0 : i32
    %c0_i32_1 = arith.constant 0 : i32
    return %c0_i32, %c0_i32_0 : i32, i32
  }
  func.func @transform_4(%arg0: i32, %arg1: i32) -> (i32, i32) {
    %c0_i32 = arith.constant 0 : i32
    %c0_i32_0 = arith.constant 0 : i32
    %c0_i32_1 = arith.constant 0 : i32
    return %c0_i32, %c0_i32_0 : i32, i32
  }
  func.func @transform_5(%arg0: i32, %arg1: i32) -> (i32, i32, i32) {
    %c0_i32 = arith.constant 0 : i32
    %c0_i32_0 = arith.constant 0 : i32
    %c0_i32_1 = arith.constant 0 : i32
    return %arg1, %c0_i32, %c0_i32_0 : i32, i32, i32
  }
  func.func @transform_6(%arg0: i32, %arg1: i32) -> (i32, i32, i32) {
    %c0_i32 = arith.constant 0 : i32
    %c0_i32_0 = arith.constant 0 : i32
    %c0_i32_1 = arith.constant 0 : i32
    return %arg1, %c0_i32, %c0_i32_0 : i32, i32, i32
  }
  func.func @transform_7(%arg0: i32, %arg1: i32) -> (i32, i32, i32) {
    %c0_i32 = arith.constant 0 : i32
    %c0_i32_0 = arith.constant 0 : i32
    %c0_i32_1 = arith.constant 0 : i32
    return %arg1, %c0_i32, %c0_i32_0 : i32, i32, i32
  }
  func.func @transform_8(%arg0: i32, %arg1: i32) -> (i32, i32, i32) {
    %c0_i32 = arith.constant 0 : i32
    %c0_i32_0 = arith.constant 0 : i32
    %c0_i32_1 = arith.constant 0 : i32
    return %arg1, %c0_i32, %c0_i32_0 : i32, i32, i32
  }
  func.func @transform_9(%arg0: i32, %arg1: i32) -> (i32, i32, i32) {
    %c0_i32 = arith.constant 0 : i32
    %c0_i32_0 = arith.constant 0 : i32
    %c0_i32_1 = arith.constant 0 : i32
    return %arg1, %c0_i32, %c0_i32_0 : i32, i32, i32
  }
  func.func @transform_10(%arg0: i32, %arg1: i32) -> (i32, i32, i32) {
    %c0_i32 = arith.constant 0 : i32
    %c0_i32_0 = arith.constant 0 : i32
    %c0_i32_1 = arith.constant 0 : i32
    return %arg1, %c0_i32, %c0_i32_0 : i32, i32, i32
  }
  func.func @transform_11(%arg0: i32, %arg1: i32) -> (i32, i32, i32) {
    %c0_i32 = arith.constant 0 : i32
    %c0_i32_0 = arith.constant 0 : i32
    %c0_i32_1 = arith.constant 0 : i32
    return %arg1, %c0_i32, %c0_i32_0 : i32, i32, i32
  }
  func.func @transform_12(%arg0: i32, %arg1: i32) -> (i32, i32, i32) {
    %c0_i32 = arith.constant 0 : i32
    %c0_i32_0 = arith.constant 0 : i32
    %c0_i32_1 = arith.constant 0 : i32
    return %arg1, %c0_i32, %c0_i32_0 : i32, i32, i32
  }
  func.func @transform_13(%arg0: i32, %arg1: i32) -> (i32, i32, i32) {
    %c0_i32 = arith.constant 0 : i32
    %c0_i32_0 = arith.constant 0 : i32
    %c0_i32_1 = arith.constant 0 : i32
    return %arg1, %c0_i32, %c0_i32_0 : i32, i32, i32
  }
  func.func @transform_14(%arg0: i32, %arg1: i32) -> (i32, i32, i32) {
    %c0_i32 = arith.constant 0 : i32
    %c0_i32_0 = arith.constant 0 : i32
    %c0_i32_1 = arith.constant 0 : i32
    return %arg1, %c0_i32, %c0_i32_0 : i32, i32, i32
  }
  func.func @transform_15(%arg0: i32, %arg1: i32) -> (i32, i32, i32) {
    %c0_i32 = arith.constant 0 : i32
    %c0_i32_0 = arith.constant 0 : i32
    %c0_i32_1 = arith.constant 0 : i32
    return %arg1, %c0_i32, %c0_i32_0 : i32, i32, i32
  }
  func.func @transform_16(%arg0: i32, %arg1: i32) -> (i32, i32, i32) {
    %c0_i32 = arith.constant 0 : i32
    %c0_i32_0 = arith.constant 0 : i32
    %c0_i32_1 = arith.constant 0 : i32
    return %arg1, %c0_i32, %c0_i32_0 : i32, i32, i32
  }
  func.func @transform_17(%arg0: i32, %arg1: i32) -> (i32, i32, i32) {
    %c0_i32 = arith.constant 0 : i32
    %c0_i32_0 = arith.constant 0 : i32
    %c0_i32_1 = arith.constant 0 : i32
    return %arg0, %c0_i32, %c0_i32_0 : i32, i32, i32
  }
}

</mosaic_0001>

<bundles_post_ra>
// kernel: tpu_custom_call.1
= control target key start
LH: loop header
LB: loop body
LE: loop exit
PB: predicated region body
PF: predicated region fallthrough
CT: control target
= control target key end

     0   :  { %s3992_s0 = inlined_call_operand.hbm [shape: f32[16,128], index: 0, kind: input, shape index: {}]   ;;  %s3993_s1 = inlined_call_operand.hbm [shape: f32[1,128], index: 1, kind: input, shape index: {}]   ;;  %s3994_s2 = inlined_call_operand.hbm [shape: f32[1,128], index: 2, kind: input, shape index: {}]   ;;  %s3995_s3 = inlined_call_operand.vmem [shape: f32[128,3], index: 3, kind: input, shape index: {}]   ;;  %s3996_s4 = inlined_call_operand.hbm [shape: f32[1,3], index: 4, kind: input, shape index: {}]   ;;  %s3997_s5 = inlined_call_operand.vmem [shape: f32[2,1,128], index: 5, kind: input, shape index: {}]   ;;  %s3998_s6 = inlined_call_operand.hbm [shape: f32[2,1,128], index: 6, kind: input, shape index: {}]   ;;  %s3999_s7 = inlined_call_operand.hbm [shape: bf16[2,128,384], index: 7, kind: input, shape index: {}]   ;;  %s4000_s8 = inlined_call_operand.vmem [shape: f32[2,1,384], index: 8, kind: input, shape index: {}]   ;;  %s4001_s9 = inlined_call_operand.vmem [shape: bf16[2,128,128], index: 9, kind: input, shape index: {}]   ;;  %s4002_s10 = inlined_call_operand.hbm [shape: f32[2,1,128], index: 10, kind: input, shape index: {}]   ;;  %s4003_s11 = inlined_call_operand.hbm [shape: f32[2,1,128], index: 11, kind: input, shape index: {}]   ;;  %s4004_s12 = inlined_call_operand.vmem [shape: f32[2,1,128], index: 12, kind: input, shape index: {}]   ;;  %s4005_s13 = inlined_call_operand.hbm [shape: bf16[2,128,256], index: 13, kind: input, shape index: {}]   ;;  %s4006_s14 = inlined_call_operand.vmem [shape: f32[2,1,256], index: 14, kind: input, shape index: {}]   ;;  %s4007_s15 = inlined_call_operand.hbm [shape: bf16[2,256,128], index: 15, kind: input, shape index: {}]   ;;  %s4008_s16 = inlined_call_operand.vmem [shape: f32[2,1,128], index: 16, kind: input, shape index: {}]   ;;  %s4009_s17 = inlined_call_operand.hbm [shape: f32[2,1,3], index: 17, kind: output, shape index: {}]  }
   0x1   :  { %4029 = sst [smem:[#allocation46_spill]] %s3992_s0 }
   0x2   :  { %4030 = sst [smem:[#allocation47_spill]] %s3993_s1 }
   0x3   :  { %4031 = sst [smem:[#allocation48_spill]] %s3994_s2 }
   0x4   :  { %4032 = sst [smem:[#allocation49_spill]] %s3995_s3 }
   0x5   :  { %4033 = sst [smem:[#allocation50_spill]] %s3996_s4 }
   0x6   :  { %4034 = sst [smem:[#allocation51_spill]] %s3997_s5 }
   0x7   :  { %4035 = sst [smem:[#allocation52_spill]] %s3998_s6 }
   0x8   :  { %4036 = sst [smem:[#allocation53_spill]] %s3999_s7 }
   0x9   :  { %4037 = sst [smem:[#allocation54_spill]] %s4000_s8 }
   0xa   :  { %4038 = sst [smem:[#allocation55_spill]] %s4001_s9 }
   0xb   :  { %4039 = sst [smem:[#allocation56_spill]] %s4002_s10 }
   0xc   :  { %4040 = sst [smem:[#allocation57_spill]] %s4003_s11 }
   0xd   :  { %4041 = sst [smem:[#allocation58_spill]] %s4004_s12 }
   0xe   :  { %4042 = sst [smem:[#allocation59_spill]] %s4005_s13 }
   0xf   :  { %4043 = sst [smem:[#allocation60_spill]] %s4006_s14 }
  0x10   :  { %4044 = sst [smem:[#allocation61_spill]] %s4007_s15 }
  0x11   :  { %4045 = sst [smem:[#allocation62_spill]] %s4008_s16 }
  0x12   :  { %4046 = sst [smem:[#allocation63_spill]] %s4009_s17 }
  0x13   :  { %22 = vsyncpa [#allocation5], 0 }
  0x14   :  { %23 = vsyncpa [#allocation8], 0 }
  0x15   :  { %24 = vsyncpa [#allocation11], 0 }
  0x16   :  { %26 = vsyncpa [#allocation11 + $0x1], 0 }
  0x17   :  { %27 = vsyncpa [#allocation14], 0 }
  0x18   :  { %29 = vsyncpa [#allocation14 + $0x1], 0 }
  0x19   :  { %30 = vsyncpa [#allocation17], 0 }
  0x1a   :  { %32 = vsyncpa [#allocation17 + $0x1], 0 }
  0x1b   :  { %33 = vsyncpa [#allocation6], 0 }
  0x1c   :  { %35 = vsyncpa [#allocation6 + $0x1], 0  ;;  %s3370_s24 = smov 0   ;;  %s3372_s25 = smov 0  }
  0x1d   :  { %s3374_s26 = smov 0   ;;  %s3376_s27 = smov 0  }
  0x1e   :  { %s3378_s28 = smov 0   ;;  %s3380_s29 = smov 0  }
  0x1f   :  { %s3382_s0 = smov 0   ;;  %s3384_s30 = smov 0  }
  0x20   :  { %s3386_s18 = smov 0   ;;  %s3388_s19 = smov 0  }
  0x21   :  { %s3390_s1 = smov 0  }
  0x22 LB: > { %4047 = sst [smem:[#allocation32_spill]] %s3223_s24  ;;  %s3424_s20 = sadd.s32 4294967295, %s3263_s1   ;;  %s3263_s1 = sphi %s3390_s1, %s41_s1   ;;  %s3259_s19 = sphi %s3388_s19, %s4116_s19   ;;  %s3255_s18 = sphi %s3386_s18, %s4120_s18   ;;  %s3251_s30 = sphi %s3384_s30, %s4114_s30   ;;  %s3247_s0 = sphi %s3382_s0, %s4119_s0   ;;  %s3243_s29 = sphi %s3380_s29, %s4113_s29   ;;  %s3239_s28 = sphi %s3378_s28, %s4118_s28   ;;  %s3235_s27 = sphi %s3376_s27, %s4117_s27   ;;  %s3231_s26 = sphi %s3374_s26, %s4111_s26   ;;  %s3227_s25 = sphi %s3372_s25, %s4110_s25   ;;  %s3223_s24 = sphi %s3370_s24, %s4109_s24  }
  0x23   : > { %4048 = sst [smem:[#allocation33_spill]] %s3227_s25  ;;  %s2257_s21 = sadd.s32 4294967294, %s3263_s1  }
  0x24   : > { %4049 = sst [smem:[#allocation34_spill]] %s3231_s26  ;;  %p183_p0 = scmp.ne.s32.totalorder %s3239_s28, %s3235_s27 }
  0x25   : > { %4050 = sst [smem:[#allocation35_spill]] %s3243_s29  ;;  %p184_p1 = scmp.eq.s32.totalorder %s3424_s20, 0 }
  0x26   : > { %4051 = sst [smem:[#allocation36_spill]] %s3247_s0  ;;  %p466_p2 = scmp.ne.s32.totalorder %s3231_s26, %s3227_s25 }
  0x27   : > { %4052 = sst [smem:[#allocation37_spill]] %s3251_s30  ;;  %p3434_p3 = por %p184_p1, %p183_p0 }
  0x28   : > { %4053 = sst [smem:[#allocation38_spill]] %s3259_s19  ;;  %p467_p4 = scmp.eq.s32.totalorder %s3424_s20, 3 }
  0x29   : > { %4054 = sst [smem:[#allocation39_spill]] %s3263_s1  ;;  %p472_p5 = scmp.ne.s32.totalorder %s3227_s25, %s3223_s24 }
  0x2a   : > { %p473_p6 = scmp.eq.s32.totalorder %s2257_s21, 3  ;;  %p3441_p7 = por %p467_p4, %p466_p2 }
  0x2b   : > { %p2258_p8 = scmp.ge.s32.totalorder %s3263_s1, 1  ;;  %p480_p10 = scmp.lt.s32.totalorder %s3263_s1, 5 }
  0x2c   : > { %s4056_s17 = scalar_select %p3441_p7, 1, 0 }
  0x2d   : > { %p3446_p9 = por %p473_p6, %p472_p5  ;;  %s4060_s2 = sld [smem:[#allocation48_spill]] }
  0x2e   : > { %4057 = sst [smem:[#allocation40_spill]] %s4056_s17  ;;  %p3454_p11 = pnand %p2258_p8, %p480_p10 }
  0x2f   : > { %s4058_s27 = scalar_select %p3446_p9, 1, 0 }
  0x30   : > { %p2647_p12 = pneg %p3454_p11  ;;  %s3265_s17 = smov [#allocation7]  }
  0x31   : > { %4059 = sst [smem:[#allocation41_spill]] %s4058_s27  ;;  %s506_s30 = sshll.u32 %s3265_s17, 4  ;;  %s507_s30 = int_to_ptr.vmem [resolvable:$true] %s506_s30 }
  0x32   : > { %p3462_p13 = pnand %p2647_p12, %p184_p1  ;;  %s50_s3 = sadd.s32 1, %s3255_s18 }
  0x33   : > { %s504_s24 = sshll.u32 %s4060_s2, 4  ;;  %p51_p0 = scmp.ge.s32.totalorder %s50_s3, 2  ;;  %s505_s24 = int_to_ptr.hbm [resolvable:$true] %s504_s24 }
  0x34   : > { %2653 = dma.hbm_to_vmem [thread:$0]  (!%p3462_p13), %s505_s24, 16, %s507_s30, [#allocation8]  }
  0x35   : > { %s53_s22 = sadd.s32 1, %s3259_s19  ;;  %s170_s2 = sadd.s32 1, %s3243_s29 }
  0x36   : > { %p177_p2 = scmp.ne.s32.totalorder %s3243_s29, %s3239_s28  ;;  %s4122_s3 = smov (%p51_p0, %s50_s3), 0 }
  0x37   : > { %4063 = sst [smem:[#allocation42_spill]] %s4122_s3  ;;  %s4124_s22 = smov (!%p51_p0, %s53_s22), %s3259_s19 }
  0x38   : > { %s167_s17 = ssub.s32 %s3255_s18, %s4122_s3  ;;  %p178_p4 = scmp.eq.s32.totalorder %s3263_s1, 0 }
  0x39   : > { %p55_p5 = scmp.ge.s32.totalorder %s4124_s22, 2  ;;  %p168_p6 = scmp.eq.s32.totalorder %s167_s17, 0 }
  0x3a   : > { %p3479_p8 = por %p178_p4, %p177_p2  ;;  %p2683_p10 = scmp.lt.s32.totalorder %s3263_s1, 4 }
  0x3b   : > { %s4126_s22 = smov (%p55_p5, %s4124_s22), 0  ;;  %s3492_s16 = sand.u32 1, %s3263_s1  }
  0x3c   : > { %4065 = sst [smem:[#allocation43_spill]] %s4126_s22  ;;  %s453_s14 = ssub.s32 %s3259_s19, %s4126_s22 }
  0x3d   : > { %s3487_s30 = scalar_select %p168_p6, %s3243_s29, %s170_s2  }
  0x3e   : > { %p454_p12 = scmp.eq.s32.totalorder %s453_s14, 0  ;;  %s3495_s17 = sand.u32 1, %s3243_s29  }
  0x3f   : > { %4066 = sst [smem:[#allocation44_spill]] %s3487_s30  ;;  %s4068_s12 = sadd.s32 1, %s3231_s26 }
  0x40   : > { %s4067_s6 = sld [smem:[#allocation52_spill]]  ;;  %s541_s22 = scalar_lea.vmem [#allocation10], %s3495_s17 }
  0x41   : > { %s3504_s5 = scalar_select %p454_p12, %s3231_s26, %s4068_s12  }
  0x42   : > { %s548_s19 = sshll.u32 %s541_s22, 4  ;;  %p3511_p0 = pnand %p2683_p10, %p3479_p8  ;;  %s549_s19 = int_to_ptr.vmem [resolvable:$true] %s548_s19 }
  0x43   : > { %4069 = sst [smem:[#allocation45_spill]] %s3504_s5  ;;  %s4022_s9 = scalar_lea.sflag [#allocation11], %s3492_s16 }
  0x44   : > { %s4071_s10 = sld [smem:[#allocation56_spill]]  ;;  %s2264_s24 = sshll.u32 %s3495_s17, 7 }
  0x45   : > { %s4025_s29 = scalar_lea.sflag [#allocation14], %s3492_s16  ;;  %s2550_s5 = sshll.u32 %s3255_s18, 7 }
  0x46   : > { %s544_s8 = scalar_lea.hbm %s4067_s6, %s3255_s18  ;;  %s595_s6 = scalar_lea.vmem [#allocation13], %s3495_s17 }
  0x47   : > { %s546_s2 = sshll.u32 %s544_s8, 4  ;;  %s602_s22 = sshll.u32 %s595_s6, 4  ;;  %s547_s2 = int_to_ptr.hbm [resolvable:$true] %s546_s2  ;;  %s603_s22 = int_to_ptr.vmem [resolvable:$true] %s602_s22 }
  0x48   : > { %2660 = dma.hbm_to_vmem [thread:$0]  (!%p3511_p0), %s547_s2, 16, %s549_s19, %s4022_s9  }
  0x49   : > { %s4072_s13 = sld [smem:[#allocation59_spill]]  ;;  %s636_s12 = scalar_lea.vmem [#allocation16], %s2264_s24 }
  0x4a   : > { %s598_s3 = scalar_lea.hbm %s4071_s10, %s3255_s18  ;;  %s644_s8 = sshll.u32 %s636_s12, 4  ;;  %s645_s8 = int_to_ptr.vmem [resolvable:$true] %s644_s8 }
  0x4b   : > { %s600_s30 = sshll.u32 %s598_s3, 4  ;;  %s633_s6 = scalar_lea.sflag [#allocation17], %s3492_s16  ;;  %s601_s30 = int_to_ptr.hbm [resolvable:$true] %s600_s30 }
  0x4c   : > { %2666 = dma.hbm_to_vmem [thread:$0]  (!%p3511_p0), %s601_s30, 16, %s603_s22, %s4025_s29  }
  0x4d   : > { %s3266_s3 = smov 128   ;;  %s3267_s10 = smov 8  }
  0x4e   : > { %s4073_s15 = sld [smem:[#allocation61_spill]]  ;;  %s665_s29 = scalar_lea.vmem [#allocation18], %s2264_s24 }
  0x4f   : > { %s641_s2 = scalar_lea.hbm %s4072_s13, %s2550_s5  ;;  %s673_s26 = sshll.u32 %s665_s29, 4  ;;  %s3543_s26 = int_to_ptr.vmem [resolvable:$true] %s673_s26 }
  0x50   : > { %s642_s9 = sshll.u32 %s641_s2, 4  ;;  %s4074_s13 = sld [smem:[#allocation47_spill]]  ;;  %s643_s9 = int_to_ptr.hbm [resolvable:$true] %s642_s9 }
  0x51   : > { %2672 = dma.hbm_to_vmem [thread:$0]  (!%p3511_p0), %s643_s9, 2048, %s645_s8, %s633_s6, %s3266_s3, %s3266_s3, %s3267_s10  }
  0x52   : > { %s3268_s25 = smov [#allocation4]   ;;  %s4075_s4 = sld [smem:[#allocation50_spill]] }
  0x53   : > { %s494_s10 = sshll.u32 %s3268_s25, 4  ;;  %s2617_s29 = smul.u32 192, %s3495_s17  ;;  %s495_s10 = int_to_ptr.vmem [resolvable:$true] %s494_s10 }
  0x54   : > { %s670_s22 = scalar_lea.hbm %s4073_s15, %s2550_s5  ;;  %s3269_s1 = smov [#allocation9]  }
  0x55   : > { %s671_s19 = sshll.u32 %s670_s22, 4  ;;  %s521_s24 = sshll.u32 %s3269_s1, 4  ;;  %s3545_s19 = int_to_ptr.hbm [resolvable:$true] %s671_s19  ;;  %s522_s24 = int_to_ptr.vmem [resolvable:$true] %s521_s24 }
  0x56   : > { %s492_s0 = sshll.u32 %s4074_s13, 4  ;;  %s2618_s3 = smul.u32 192, %s3255_s18  ;;  %s493_s0 = int_to_ptr.hbm [resolvable:$true] %s492_s0 }
  0x57   : > { %2650 = dma.hbm_to_vmem [thread:$0]  (!%p3462_p13), %s493_s0, 16, %s495_s10, [#allocation5]  }
  0x58   : > { %s519_s5 = sshll.u32 %s4075_s4, 4  ;;  %s4076_s7 = sld [smem:[#allocation53_spill]]  ;;  %s520_s5 = int_to_ptr.hbm [resolvable:$true] %s519_s5 }
  0x59   : > { %2656 = dma.hbm_to_vmem [thread:$0]  (!%p3462_p13), %s520_s5, 16, %s522_s24, [#allocation8]  }
  0x5a   : > { %s559_s22 = scalar_lea.vmem [#allocation12], %s2617_s29  ;;  %s3270_s12 = smov 192  }
  0x5b   : > { %s567_s2 = sshll.u32 %s559_s22, 4  ;;  %s3271_s10 = smov 12   ;;  %s568_s2 = int_to_ptr.vmem [resolvable:$true] %s567_s2 }
  0x5c   : > { %s4077_s27 = scalar_lea.sflag [#allocation11], %s3492_s16  ;;  %s4078_s11 = sld [smem:[#allocation57_spill]] }
  0x5d   : > { %s612_s1 = scalar_lea.vmem [#allocation15], %s3495_s17  ;;  %s3272_s13 = smov 64  }
  0x5e   : > { %s564_s30 = scalar_lea.hbm %s4076_s7, %s2618_s3  ;;  %s619_s24 = sshll.u32 %s612_s1, 4  ;;  %s620_s24 = int_to_ptr.vmem [resolvable:$true] %s619_s24 }
  0x5f   : > { %s565_s0 = sshll.u32 %s564_s30, 4  ;;  %s4079_s3 = scalar_lea.sflag [#allocation14], %s3492_s16  ;;  %s566_s0 = int_to_ptr.hbm [resolvable:$true] %s565_s0 }
  0x60   : > { %2663 = dma.hbm_to_vmem [thread:$0]  (!%p3511_p0), %s566_s0, 3072, %s568_s2, %s4077_s27, %s3270_s12, %s3270_s12, %s3271_s10  }
  0x61   : > { %s3273_s25 = smov 4   ;;  %691 = sbr.rel (%p3454_p11) target bundleno = 2793 (0xae9), region = 84 }
  0x62   : > { %s615_s5 = scalar_lea.hbm %s4078_s11, %s3255_s18 }
  0x63   : > { %s617_s29 = sshll.u32 %s615_s5, 4  ;;  %s618_s29 = int_to_ptr.hbm [resolvable:$true] %s617_s29 }
  0x64   : > { %2669 = dma.hbm_to_vmem [thread:$0]  (!%p3511_p0), %s618_s29, 16, %s620_s24, %s4079_s3  }
  0x65   : > { %2675 = dma.hbm_to_vmem [thread:$0]  (!%p3511_p0), %s3545_s19, 2048, %s3543_s26, %s633_s6, %s3272_s13, %s3272_s13, %s3273_s25  }
  0x66   : > { %3196 = dma.done.wait (%p184_p1), [#allocation5], 16  }
  0x67   : > { %3198 = vsyncadd (%p184_p1), [#allocation5], 4294967280 }
  0x68   : > { %3200 = dma.done.wait (%p184_p1), [#allocation8], 32  }
  0x69   : > { %3202 = vsyncadd (%p184_p1), [#allocation8], 4294967264  ;;  %s708_s16 = sand.u32 1, %s3424_s20   ;;  %s3593_s17 = sand.u32 1, %s3239_s28  }
  0x6a   : > { %s709_s21 = scalar_lea.sflag [#allocation11], %s708_s16 }
  0x6b   : > { %3204 = dma.done.wait (%p3434_p3), %s709_s21, 3088  }
  0x6c   : > { %3206 = vsyncadd (%p3434_p3), %s709_s21, 4294964208  ;;  %s2619_s6 = smul.u32 192, %s3593_s17  ;;  %s728_s19 = scalar_lea.sflag [#allocation14], %s708_s16 }
  0x6e   : > { %s3601_s26 = scalar_lea.vmem [#allocation12], %s2619_s6 }
  0x6f   : > { %3208 = dma.done.wait (%p3434_p3), %s728_s19, 32  }
  0x70   : > { %3210 = vsyncadd (%p3434_p3), %s728_s19, 4294967264  ;;  %s2274_s20 = sshll.u32 %s3593_s17, 7  ;;  %s746_s2 = scalar_lea.sflag [#allocation17], %s708_s16 }
  0x71   : > { %s3610_s0 = scalar_lea.vmem [#allocation16], %s2274_s20 }
  0x72   : > { %3212 = dma.done.wait (%p3434_p3), %s746_s2, 4096  }
  0x73   : > { %3214 = vsyncadd (%p3434_p3), %s746_s2, 4294963200  ;;  %s4080_s12 = sld [smem:[#allocation33_spill]]  ;;  %s3651_s13 = scalar_lea.vmem [#allocation18], %s2274_s20 }
  0x74   : > { %s4081_s10 = sld [smem:[#allocation36_spill]] }
  0x75   : > { %s4083_s25 = sld [smem:[#allocation58_spill]] }
  0x76   : > { %s4084_s19 = sld [smem:[#allocation54_spill]] }
  0x77   : > { %s4085_s8 = sld [smem:[#allocation55_spill]] }
  0x78   : > { %s4086_s1 = sld [smem:[#allocation62_spill]] }
  0x79   : > { %s4087_s15 = sld [smem:[#allocation60_spill]] }
  0x7a   : > { %p852_p1 = scmp.lt.s32.totalorder %s4081_s10, 1  ;;  %p2279_p3 = scmp.ne.s32.totalorder %s4081_s10, 0 }
  0x7b   : > { %s4089_s30 = sld [smem:[#allocation37_spill]] (!%p2279_p3) }
  0x7c   : > { %s3619_s9 = scalar_select %p852_p1, %s4081_s10, 1 }
  0x7e   : > { %s2620_s23 = smul.u32 3, %s3619_s9  ;;  %s2552_s29 = sshll.u32 %s3619_s9, 6 }
  0x7f   : > { %s866_s16 = scalar_lea.vmem %s4083_s25, %s3619_s9  ;;  %s3639_s5 = scalar_lea.vmem %s4085_s8, %s2552_s29 }
  0x80   : > { %s3634_s2 = scalar_lea.vmem %s4084_s19, %s2620_s23  ;;  %s2278_s14 = sshll.u32 %s3619_s9, 1 }
  0x81   : > { %s873_s24 = scalar_lea.vmem %s4086_s1, %s3619_s9  ;;  %s3649_s3 = scalar_lea.vmem %s4087_s15, %s2278_s14 }
  0x82   : > { %s4088_s25 = sand.u32 1, %s4080_s12   ;;  %878 = sbr.rel (%p2279_p3) target bundleno = 422 (0x1a6), region = 124 }
  0x83   : > { %s3655_s23 = scalar_lea.vmem [#allocation19], %s4088_s25  ;;  %s2280_s22 = sshll.u32 (!%p2279_p3), %s4089_s30, 3 }
  0x87   : > { %s4090_s6 = sld [smem:[#allocation46_spill]]  ;;  %s3274_s19 = smov [#allocation2]  }
  0x88   : > { %s890_s8 = sshll.u32 %s3274_s19, 4  ;;  %s891_s8 = int_to_ptr.vmem [resolvable:$true] %s890_s8 }
  0x8d   : > { %s880_s4 = scalar_lea.hbm %s4090_s6, %s2280_s22  ;;  %s3103_s20 = scalar_lea.hbm %s4090_s6, 16 }
  0x8e   : > { %s888_s27 = sshll.u32 %s880_s4, 4  ;;  %s889_s27 = int_to_ptr.hbm [resolvable:$true] %s888_s27 }
  0x8f   : > { %s3099_s7 = sshra.s32 %s889_s27, 4  ;;  %s3100_s7 = int_to_ptr.hbm [resolvable:$true] %s3099_s7 }
  0x90   : > { %s3101_s11 = scalar_lea.hbm %s3100_s7, 8  ;;  %p3104_p13 = scmp.lt.s32.totalorder %s3100_s7, %s4090_s6 }
  0x91   : > { %p3102_p11 = scmp.ne.s32.totalorder %s3100_s7, %s3101_s11  ;;  %p3105_p2 = scmp.lt.s32.totalorder %s3103_s20, %s3101_s11 }
  0x93   : > { %p3106_p4 = por %p3105_p2, %p3104_p13 }
  0x95   : > { %p3107_p5 = pnand %p3106_p4, %p3102_p11 }
  0x97   : > { %3110 = shalt.err (!%p3107_p5)  }
  0x98   : > { %893 = dma.hbm_to_vmem [thread:$0]  %s889_s27, 128, %s891_s8, [#allocation20] }
  0x99   : > { %3215 = dma.done.wait [#allocation20], 128 }
  0x9a   : > { %3216 = vsyncadd [#allocation20], 4294967168  ;;  %v897_v0 = vld [vmem:[#allocation2] sm:$0xff]  ;;  %v3275_v1 = vmov 128.0   ;;  %v2791_v21 = vld [vmem:[#allocation4] ss:$0 sm:$0xff] }
  0x9b   : > { %900 = vadd.xlane.f32.xlu0 %v897_v0  ;;  %2793 = vrcp.f32 %v3275_v1  ;;  %v2792_v23 = vld [vmem:[#allocation7] ss:$0 sm:$0xff] }
  0xa1   : > { %v2794_v2 = vpop.eup %2793 }
  0xa2   : > { %v903_v3 = vmul.f32 128.0, %v2794_v2  ;;  %vm907_vm0 = vweird.f32 %v2794_v2 }
  0xa4   : > { %v904_v4 = vsub.f32 1.0, %v903_v3 }
  0xa6   : > { %v905_v5 = vmul.f32 %v2794_v2, %v904_v4 }
  0xa8   : > { %v906_v6 = vadd.f32 %v2794_v2, %v905_v5 }
  0xaa   : > { %v908_v7 = vsel %vm907_vm0, %v2794_v2, %v906_v6 }
 0x10e   : > { %v901_v8 = vpop.xlane.xlu0 %900 }
 0x10f   : > { %v909_v9 = vmul.f32 %v908_v7, %v901_v8 }
 0x111   : > { %v910_v10 = vsub.f32 %v897_v0, %v909_v9 }
 0x113   : > { %v911_v11 = vmul.f32 %v910_v10, %v910_v10 }
 0x115   : > { %912 = vadd.xlane.f32.xlu0 %v911_v11 }
 0x188   : > { %v913_v12 = vpop.xlane.xlu0 %912 }
 0x189   : > { %v914_v13 = vmul.f32 %v913_v12, %v908_v7 }
 0x18b   : > { %v915_v14 = vadd.f32 1e-12, %v914_v13 }
 0x18d   : > { %2795 = vrsqrt.f32 %v915_v14  ;;  %vm922_vm2 = vweird.f32 %v915_v14 }
 0x193   : > { %v2796_v15 = vpop.eup %2795 }
 0x194   : > { %v917_v16 = vmul.f32 %v2796_v15, %v915_v14  ;;  %vm923_vm1 = vweird.f32 %v2796_v15 }
 0x195   : > { %vm924_vm3 = vmor %vm922_vm2, %vm923_vm1 }
 0x196   : > { %v918_v17 = vmul.f32 %v2796_v15, %v917_v16 }
 0x198   : > { %v919_v18 = vmul.f32 0.5, %v918_v17 }
 0x19a   : > { %v920_v19 = vsub.f32 1.5, %v919_v18 }
 0x19c   : > { %v921_v20 = vmul.f32 %v2796_v15, %v920_v19 }
 0x19e   : > { %v925_v22 = vsel %vm924_vm3, %v2796_v15, %v921_v20 }
 0x19f   : > { %v926_v24 = vmul.f32 %v925_v22, %v910_v10 }
 0x1a1   : > { %v930_v25 = vmul.f32 %v2791_v21, %v926_v24 }
 0x1a3   : > { %v934_v26 = vadd.f32 %v2792_v23, %v930_v25 }
 0x1a5   : > { %935 = vst [vmem:[#allocation2] sm:$0xff] %v934_v26 }
 0x1a6 PF: > { %v3276_v28 = vmov 128.0   ;;  %v2367_v29 = vld [vmem:[%s3601_s26 + $0xa8] sm:$0xf]  ;;  %v2575_v30 = vld [vmem:[%s3601_s26 + $0xb0] sm:$0xf0]  ;;  %s4091_s25 = sld [smem:[#allocation51_spill]] }
 0x1a7   : > { %2803 = vrcp.f32 %v3276_v28  ;;  %v2574_v31 = vld [vmem:[%s3601_s26 + $0xac] sm:$0xf]  ;;  %v2368_v32 = vor.u32 %v2575_v30, %v2367_v29  ;;  %v2369_v33 = vld [vmem:[%s3601_s26 + $0xb4] sm:$0xf0]  ;;  %v2375_v34 = vld [vmem:[%s3601_s26 + $0xb0] sm:$0xf] }
 0x1a8   : > { %v2576_v35 = vld [vmem:[%s3601_s26 + $0xb8] sm:$0xf0]  ;;  %v2372_v36 = vor.u32 %v2574_v31, %v2369_v33  ;;  %v2355_v48 = vld [vmem:[%s3601_s26 + $0x90] sm:$0xf]  ;;  %v2571_v50 = vld [vmem:[%s3601_s26 + $0x94] sm:$0xf] }
 0x1a9   : > { %v2376_v37 = vor.u32 %v2576_v35, %v2375_v34  ;;  %1143 = vmatpush.bf16.msra.mxu0 %v2368_v32  ;;  %v2572_v49 = vld [vmem:[%s3601_s26 + $0x98] sm:$0xf0]  ;;  %v2357_v52 = vld [vmem:[%s3601_s26 + $0x9c] sm:$0xf0]  ;;  %v2363_v53 = vld [vmem:[%s3601_s26 + $0x98] sm:$0xf] }
 0x1aa   : > { %1156 = vmatpush.bf16.msra.mxu1 %v2372_v36  ;;  %v2356_v51 = vor.u32 %v2572_v49, %v2355_v48  ;;  %v2573_v54 = vld [vmem:[%s3601_s26 + $0xa0] sm:$0xf0]  ;;  %v2360_v55 = vor.u32 %v2571_v50, %v2357_v52  ;;  %v2343_v57 = vld [vmem:[%s3601_s26 + $0x78] sm:$0xf]  ;;  %v2568_v59 = vld [vmem:[%s3601_s26 + $0x7c] sm:$0xf] }
 0x1ab   : > { %1169 = vmatpush.bf16.msra.mxu2 %v2376_v37  ;;  %v2364_v56 = vor.u32 %v2573_v54, %v2363_v53  ;;  %v2569_v58 = vld [vmem:[%s3601_s26 + $0x80] sm:$0xf0]  ;;  %v2345_v61 = vld [vmem:[%s3601_s26 + $0x84] sm:$0xf0]  ;;  %v2351_v62 = vld [vmem:[%s3601_s26 + $0x80] sm:$0xf] }
 0x1ac   : > { %v3668_v27 = vld [vmem:[#allocation2] sm:$0xff]  ;;  %v2344_v60 = vor.u32 %v2569_v58, %v2343_v57  ;;  %v2348_v0 = vor.u32 %v2568_v59, %v2345_v61  ;;  %v2331_v2 = vld [vmem:[%s3601_s26 + $0x60] sm:$0xf]  ;;  %v2565_v4 = vld [vmem:[%s3601_s26 + $0x64] sm:$0xf]  ;;  %s4092_s30 = scalar_lea.vmem %s4091_s25, %s3619_s9  ;;  %s4093_s22 = scalar_lea.vmem [#allocation10], %s3593_s17 }
 0x1ad   : > { %939 = vadd.xlane.f32.xlu0 %v3668_v27  ;;  %v2804_v38 = vpop.eup %2803  ;;  %1144 = vmatpush.bf16.msra.mxu0 %v2356_v51  ;;  %v2570_v63 = vld [vmem:[%s3601_s26 + $0x88] sm:$0xf0]  ;;  %v2333_v6 = vld [vmem:[%s3601_s26 + $0x6c] sm:$0xf0]  ;;  %v2339_v7 = vld [vmem:[%s3601_s26 + $0x68] sm:$0xf] }
 0x1ae   : > { %v942_v39 = vmul.f32 128.0, %v2804_v38  ;;  %vm946_vm4 = vweird.f32 %v2804_v38  ;;  %1157 = vmatpush.bf16.msra.mxu1 %v2360_v55  ;;  %v2352_v1 = vor.u32 %v2570_v63, %v2351_v62  ;;  %v2566_v3 = vld [vmem:[%s3601_s26 + $0x68] sm:$0xf0]  ;;  %v2567_v8 = vld [vmem:[%s3601_s26 + $0x70] sm:$0xf0]  ;;  %v2336_v9 = vor.u32 %v2565_v4, %v2333_v6  ;;  %s3278_s29 = smov 96  }
 0x1af   : > { %1170 = vmatpush.bf16.msra.mxu2 %v2364_v56  ;;  %v2332_v5 = vor.u32 %v2566_v3, %v2331_v2  ;;  %v2340_v10 = vor.u32 %v2567_v8, %v2339_v7  ;;  %v2319_v11 = vld [vmem:[%s3601_s26 + $0x48] sm:$0xf]  ;;  %v2563_v12 = vld [vmem:[%s3601_s26 + $0x50] sm:$0xf0]  ;;  %v2562_v13 = vld [vmem:[%s3601_s26 + $0x4c] sm:$0xf] }
 0x1b0   : > { %v943_v40 = vsub.f32 1.0, %v942_v39  ;;  %v2320_v14 = vor.u32 %v2563_v12, %v2319_v11  ;;  %v2321_v15 = vld [vmem:[%s3601_s26 + $0x54] sm:$0xf0]  ;;  %v2327_v16 = vld [vmem:[%s3601_s26 + $0x50] sm:$0xf]  ;;  %vm1184_vm8 = vcmask 261120  }
 0x1b1   : > { %1145 = vmatpush.bf16.msra.mxu0 %v2344_v60  ;;  %v2564_v17 = vld [vmem:[%s3601_s26 + $0x58] sm:$0xf0]  ;;  %v2324_v18 = vor.u32 %v2562_v13, %v2321_v15  ;;  %v2307_v20 = vld [vmem:[%s3601_s26 + $0x30] sm:$0xf]  ;;  %v2559_v22 = vld [vmem:[%s3601_s26 + $0x34] sm:$0xf] }
 0x1b2   : > { %v944_v41 = vmul.f32 %v2804_v38, %v943_v40  ;;  %1158 = vmatpush.bf16.msra.mxu1 %v2348_v0  ;;  %v2328_v19 = vor.u32 %v2564_v17, %v2327_v16  ;;  %v2560_v21 = vld [vmem:[%s3601_s26 + $0x38] sm:$0xf0]  ;;  %v2309_v24 = vld [vmem:[%s3601_s26 + $0x3c] sm:$0xf0]  ;;  %v2315_v25 = vld [vmem:[%s3601_s26 + $0x38] sm:$0xf] }
 0x1b3   : > { %1171 = vmatpush.bf16.msra.mxu2 %v2352_v1  ;;  %v2308_v23 = vor.u32 %v2560_v21, %v2307_v20  ;;  %v2561_v26 = vld [vmem:[%s3601_s26 + $0x40] sm:$0xf0]  ;;  %v2312_v28 = vor.u32 %v2559_v22, %v2309_v24  ;;  %v2295_v30 = vld [vmem:[%s3601_s26 + $0x18] sm:$0xf]  ;;  %v2556_v32 = vld [vmem:[%s3601_s26 + $0x1c] sm:$0xf] }
 0x1b4   : > { %v945_v42 = vadd.f32 %v2804_v38, %v944_v41  ;;  %v2316_v29 = vor.u32 %v2561_v26, %v2315_v25  ;;  %v2557_v31 = vld [vmem:[%s3601_s26 + $0x20] sm:$0xf0]  ;;  %v2297_v34 = vld [vmem:[%s3601_s26 + $0x24] sm:$0xf0]  ;;  %v2303_v35 = vld [vmem:[%s3601_s26 + $0x20] sm:$0xf] }
 0x1b5   : > { %1146 = vmatpush.bf16.msra.mxu0 %v2332_v5  ;;  %v2296_v33 = vor.u32 %v2557_v31, %v2295_v30  ;;  %v2558_v36 = vld [vmem:[%s3601_s26 + $0x28] sm:$0xf0]  ;;  %v2300_v37 = vor.u32 %v2556_v32, %v2297_v34  ;;  %v2283_v39 = vld [vmem:[%s3601_s26] sm:$0xf]  ;;  %v2553_v41 = vld [vmem:[%s3601_s26 + $0x4] sm:$0xf] }
 0x1b6   : > { %v3677_v43 = vsel %vm946_vm4, %v2804_v38, %v945_v42  ;;  %1159 = vmatpush.bf16.msra.mxu1 %v2336_v9  ;;  %v2304_v38 = vor.u32 %v2558_v36, %v2303_v35  ;;  %v2554_v40 = vld [vmem:[%s3601_s26 + $0x8] sm:$0xf0]  ;;  %v2797_v59 = vld [vmem:[%s4092_s30] ss:$0 sm:$0xff]  ;;  %vm1222_vm9 = vcmask 1043456   ;;  %s3279_s21 = smov 32  }
 0x1b7   : > { %1172 = vmatpush.bf16.msra.mxu2 %v2340_v10  ;;  %v2284_v42 = vor.u32 %v2554_v40, %v2283_v39  ;;  %v2798_v62 = vld [vmem:[%s4093_s22] ss:$0 sm:$0xff]  ;;  %vm1205_vm10 = vcmask 64512   ;;  %vm1310_vm11 = vcmask 523520   ;;  %vm1373_vm12 = vcmask 785920   ;;  %s4094_s4 = scalar_lea.vmem [#allocation13], %s3593_s17 }
 0x1b8   : > { %v1007_v2 = vld [vmem:[%s3634_s2] sm:$0x7]  ;;  %s3277_s2 = smov 64   ;;  %vm1436_vm13 = vcmask 1048320  }
 0x1b9   : > { %1147 = vmatpush.bf16.msra.mxu0 %v2320_v14  ;;  %v1010_v3 = vperm.slane %v1007_v2, 1  ;;  %v1009_v4 = vperm.slane %v1007_v2, 0  ;;  %v1011_v10 = vperm.slane %v1007_v2, 2 }
 0x1ba   : > { %1160 = vmatpush.bf16.msra.mxu1 %v2324_v18 }
 0x1bb   : > { %1173 = vmatpush.bf16.msra.mxu2 %v2328_v19 }
 0x1bd   : > { %1148 = vmatpush.bf16.msra.mxu0 %v2308_v23 }
 0x1be   : > { %1161 = vmatpush.bf16.msra.mxu1 %v2312_v28 }
 0x1bf   : > { %1174 = vmatpush.bf16.msra.mxu2 %v2316_v29 }
 0x1c1   : > { %1149 = vmatpush.bf16.msra.mxu0 %v2296_v33 }
 0x1c2   : > { %1162 = vmatpush.bf16.msra.mxu1 %v2300_v37 }
 0x1c3   : > { %1175 = vmatpush.bf16.msra.mxu2 %v2304_v38 }
 0x1c5   : > { %1150 = vmatpush.bf16.msra.mxu0 %v2284_v42 }
 0x220   : > { %v940_v44 = vpop.xlane.xlu0 %939 }
 0x221   : > { %v948_v45 = vmul.f32 %v3677_v43, %v940_v44  ;;  %v2285_v44 = vld [vmem:[%s3601_s26 + $0xc] sm:$0xf0] }
 0x222   : > { %v2288_v48 = vor.u32 %v2553_v41, %v2285_v44 }
 0x223   : > { %v3681_v46 = vsub.f32 %v3668_v27, %v948_v45  ;;  %v2291_v45 = vld [vmem:[%s3601_s26 + $0x8] sm:$0xf] }
 0x224   : > { %1163 = vmatpush.bf16.msra.mxu1 %v2288_v48 }
 0x225   : > { %v950_v47 = vmul.f32 %v3681_v46, %v3681_v46 }
 0x227   : > { %951 = vadd.xlane.f32.xlu0 %v950_v47  ;;  %v2555_v47 = vld [vmem:[%s3601_s26 + $0x10] sm:$0xf0] }
 0x228   : > { %v2292_v49 = vor.u32 %v2555_v47, %v2291_v45 }
 0x22a   : > { %1176 = vmatpush.bf16.msra.mxu2 %v2292_v49 }
 0x29a   : > { %v952_v50 = vpop.xlane.xlu0 %951 }
 0x29b   : > { %v953_v51 = vmul.f32 %v952_v50, %v3677_v43 }
 0x29d   : > { %v954_v52 = vadd.f32 1e-05, %v953_v51 }
 0x29f   : > { %2805 = vrsqrt.f32 %v954_v52  ;;  %vm961_vm6 = vweird.f32 %v954_v52 }
 0x2a5   : > { %v2806_v53 = vpop.eup %2805 }
 0x2a6   : > { %v956_v54 = vmul.f32 %v2806_v53, %v954_v52  ;;  %vm962_vm5 = vweird.f32 %v2806_v53 }
 0x2a7   : > { %vm963_vm7 = vmor %vm961_vm6, %vm962_vm5 }
 0x2a8   : > { %v957_v55 = vmul.f32 %v2806_v53, %v956_v54 }
 0x2aa   : > { %v958_v56 = vmul.f32 0.5, %v957_v55 }
 0x2ac   : > { %v959_v57 = vsub.f32 1.5, %v958_v56 }
 0x2ae   : > { %v960_v58 = vmul.f32 %v2806_v53, %v959_v57 }
 0x2b0   : > { %v964_v60 = vsel %vm963_vm7, %v2806_v53, %v960_v58 }
 0x2b1   : > { %v965_v61 = vmul.f32 %v964_v60, %v3681_v46 }
 0x2b3   : > { %v969_v63 = vmul.f32 %v2797_v59, %v965_v61 }
 0x2b5   : > { %v973_v0 = vadd.f32 %v2798_v62, %v969_v63 }
 0x2b7   : > { %v1006_v1 = vpack.c.bf16 %v973_v0, %v973_v0 }
 0x2b9   : > { %1151 = vmatmul.bf16.vlgmr.msra.gmra.mxu0 %v1006_v1  ;;  %1164 = vmatmul.bf16.vlgmr.msra.gmra.mxu1 %v1006_v1 }
 0x2ba   : > { %1177 = vmatmul.bf16.vlgmr.msra.gmra.mxu2 %v1006_v1 }
 0x336   : > { %v1152_v5 = vpop.f32.mrf.mxu0  ;;  %v1165_v6 = vpop.f32.mrf.mxu1 }
 0x337   : > { %v1166_v7 = vadd.f32 %v1165_v6, %v1010_v3  ;;  %v1153_v8 = vadd.f32 %v1152_v5, %v1009_v4 }
 0x339   : > { %v1183_v9 = vpack.c.bf16 %v1166_v7, %v1166_v7  ;;  %v1182_v12 = vpack.c.bf16 %v1153_v8, %v1153_v8 }
 0x33b   : > { %v1246_v11 = vunpack.c.l.b16 %v1183_v9  ;;  %v1189_v46 = vsel %vm1184_vm8, %v1183_v9, 0  ;;  %v1241_v19 = vunpack.c.l.b16 %v1182_v12 }
 0x33c   : > { %1198 = vmatpush.bf16.xpose.msra.mxu3 %v1189_v46 }
 0x33d   : > { %v1247_v13 = vpack.c.b16 %v1246_v11, %v1246_v11  ;;  %v1178_v14 = vpop.f32.mrf.mxu2  ;;  %v1242_v21 = vpack.c.b16 %v1241_v19, %v1241_v19 }
 0x33e   : > { %v1179_v15 = vadd.f32 %v1178_v14, %v1011_v10  ;;  %v1154_v16 = vpop.f32.mrf.mxu0  ;;  %v1167_v17 = vpop.f32.mrf.mxu1 }
 0x33f   : > { %1314 = vrot.lane.b32.xlu0 %v1247_v13, %s3277_s2  ;;  %1248 = vrot.lane.b32.xlu2 %v1247_v13, %s3278_s29 }
 0x340   : > { %v1218_v18 = vpack.c.bf16 %v1179_v15, %v1179_v15 }
 0x342   : > { %v1224_v20 = vsel %vm1222_vm9, %v1218_v18, 0  ;;  %v1283_v44 = vunpack.c.l.b16 %v1218_v18 }
 0x343   : > { %2377 = vmatmul.msk.bf16.vlgmr.msra.gmra.mxu3 %vm1184_vm8, %v1182_v12 }
 0x344   : > { %1233 = vmatpush.bf16.msrb.mxu3 %v1224_v20  ;;  %v1284_v45 = vpack.c.b16 %v1283_v44, %v1283_v44  ;;  %v2580_v44 = vld [vmem:[%s3639_s5 + $0x18] sm:$0xff] }
 0x345   : > { %v1180_v22 = vpop.f32.mrf.mxu2 }
 0x347   : > { %1243 = vrot.lane.b32.xlu2 %v1242_v21, %s3278_s29 }
 0x34f   : > { %1312 = vrot.lane.b32.xlu2 %v1242_v21, %s3277_s2 }
 0x357   : > { %1375 = vrot.lane.b32.xlu2 %v1242_v21, %s3279_s21 }
 0x399   : > { %v1249_v23 = vpop.permute.xlu2 %1248 }
 0x39a   : > { %v1254_v24 = vsel %vm1184_vm8, %v1249_v23, 0 }
 0x39b   : > { %1263 = vmatpush.bf16.xpose.msra.mxu3 %v1254_v24 }
 0x3a1   : > { %v1244_v25 = vpop.permute.xlu2 %1243 }
 0x3a9   : > { %v1313_v29 = vpop.permute.xlu2 %1312 }
 0x3b1   : > { %v1315_v26 = vpop.permute.xlu0 %1314  ;;  %v1376_v56 = vpop.permute.xlu2 %1375 }
 0x3b2   : > { %v1320_v28 = vsel %vm1184_vm8, %v1315_v26, 0 }
 0x3b3   : > { %1329 = vmatpush.bf16.xpose.msrb.mxu2 %v1320_v28 }
 0x3ba   : > { %2381 = vmatmul.msk.bf16.vlgmr.msrb.gmra.mxu2 %vm1184_vm8, %v1313_v29 }
 0x3c6   : > { %v1200_v30 = vpop.f32.mrf.mxu3 }
 0x3c7   : > { %v1204_v31 = vmul.f32 0.17677669, %v1200_v30 }
 0x3c9   : > { %v1206_v32 = vsel %vm1205_vm10, %v1204_v31, -inf }
 0x3ca   : > { %1207 = vmax.xlane.f32.xlu1 %v1206_v32 }
 0x3ce   : > { %v1202_v33 = vpop.f32.mrf.mxu3 }
 0x43d   : > { %v1331_v34 = vpop.f32.mrf.mxu2  ;;  %v1208_v36 = vpop.xlane.xlu1 %1207 }
 0x43e   : > { %v1335_v35 = vmul.f32 0.17677669, %v1331_v34  ;;  %v1209_v37 = vsub.f32 %v1204_v31, %v1208_v36  ;;  %v2584_v36 = vld [vmem:[%s3639_s5 + $0x38] sm:$0xff] }
 0x43f   : > { %1504 = vmatpush.bf16.msrb.mxu1 %v2584_v36  ;;  %v2587_v36 = vld [vmem:[%s3610_s0 + $0x14] sm:$0xf] }
 0x440   : > { %v1336_v38 = vsel %vm1205_vm10, %v1335_v35, -inf  ;;  %v1210_v39 = vmul.f32 1.442695, %v1209_v37  ;;  %v2583_v37 = vld [vmem:[%s3639_s5 + $0x30] sm:$0xff] }
 0x441   : > { %1337 = vmax.xlane.f32.xlu0 %v1336_v38 }
 0x442   : > { %2807 = vpow2.f32 %v1210_v39  ;;  %v2582_v39 = vld [vmem:[%s3639_s5 + $0x28] sm:$0xff] }
 0x443   : > { %1505 = vmatpush.bf16.msrb.mxu1 %v2583_v37 }
 0x445   : > { %v1333_v40 = vpop.f32.mrf.mxu2 }
 0x447   : > { %1506 = vmatpush.bf16.msrb.mxu1 %v2582_v39 }
 0x448   : > { %v2808_v41 = vpop.eup %2807 }
 0x449   : > { %v1212_v42 = vsel %vm1205_vm10, %v2808_v41, 0.0 }
 0x44a   : > { %1213 = vadd.xlane.f32.xlu1 %v1212_v42  ;;  %v2581_v42 = vld [vmem:[%s3639_s5 + $0x20] sm:$0xff] }
 0x44b   : > { %1507 = vmatpush.bf16.msrb.mxu1 %v2581_v42  ;;  %v2585_v42 = vld [vmem:[%s3610_s0 + $0x4] sm:$0xf] }
 0x44f   : > { %1508 = vmatpush.bf16.msrb.mxu1 %v2580_v44 }
 0x455   : > { %1285 = vrot.lane.b32.xlu0 %v1284_v45, %s3278_s29 }
 0x463   : > { %1377 = vrot.lane.b32.xlu1 %v1247_v13, %s3279_s21 }
 0x4b4   : > { %v1338_v48 = vpop.xlane.xlu0 %1337 }
 0x4b5   : > { %v1339_v59 = vsub.f32 %v1335_v35, %v1338_v48  ;;  %v2577_v48 = vld [vmem:[%s3639_s5] sm:$0xff] }
 0x4b7   : > { %v1340_v60 = vmul.f32 1.442695, %v1339_v59  ;;  %v2475_v59 = vld [vmem:[%s3610_s0 + $0x70] sm:$0xf] }
 0x4bd   : > { %v1214_v47 = vpop.xlane.xlu1 %1213 }
 0x4be   : > { %2809 = vrcp.f32 %v1214_v47  ;;  %v2578_v47 = vld [vmem:[%s3639_s5 + $0x8] sm:$0xff] }
 0x4bf   : > { %2811 = vpow2.f32 %v1340_v60  ;;  %v2600_v60 = vld [vmem:[%s3610_s0 + $0x74] sm:$0xf0] }
 0x4c4   : > { %v2810_v49 = vpop.eup %2809 }
 0x4c5   : > { %v1216_v50 = vmul.f32 %v2810_v49, %v2808_v41  ;;  %v2812_v0 = vpop.eup %2811 }
 0x4c6   : > { %v1342_v2 = vsel %vm1205_vm10, %v2812_v0, 0.0 }
 0x4c7   : > { %v1286_v51 = vpop.permute.xlu0 %1285  ;;  %v1217_v52 = vpack.c.bf16 %v1216_v50, %v1216_v50 }
 0x4c8   : > { %v1291_v53 = vsel %vm1222_vm9, %v1286_v51, 0 }
 0x4c9   : > { %1300 = vmatpush.bf16.msrb.mxu0 %v1291_v53  ;;  %2378 = vmatmul.msk.bf16.vlgmr.msrb.gmra.mxu3 %vm1205_vm10, %v1217_v52 }
 0x4d5   : > { %v1378_v54 = vpop.permute.xlu1 %1377 }
 0x4d6   : > { %v1383_v55 = vsel %vm1184_vm8, %v1378_v54, 0  ;;  %v2799_v54 = vld [vmem:[%s4094_s4] ss:$0 sm:$0xff] }
 0x4d7   : > { %1392 = vmatpush.bf16.xpose.msrb.mxu3 %v1383_v55 }
 0x4d9   : > { %2379 = vmatmul.msk.bf16.vlgmr.msra.gmra.mxu3 %vm1184_vm8, %v1244_v25 }
 0x4e9   : > { %2383 = vmatmul.msk.bf16.vlgmr.msrb.gmra.mxu3 %vm1184_vm8, %v1376_v56 }
 0x54c   : > { %v1235_v57 = vpop.f32.mrf.mxu3 }
 0x54d   : > { %1239 = vst.msk [vmem:[#allocation3] sm:$0xff] %vm1184_vm8, %v1235_v57 }
 0x554   : > { %v1237_v58 = vpop.f32.mrf.mxu3 }
 0x55c   : > { %v1265_v61 = vpop.f32.mrf.mxu3 }
 0x55d   : > { %v1269_v62 = vmul.f32 0.17677669, %v1265_v61  ;;  %v2599_v61 = vld [vmem:[%s3610_s0 + $0x74] sm:$0xf] }
 0x55f   : > { %v1270_v63 = vsel %vm1205_vm10, %v1269_v62, -inf }
 0x560   : > { %1271 = vmax.xlane.f32.xlu2 %v1270_v63  ;;  %v2477_v63 = vld [vmem:[%s3610_s0 + $0x78] sm:$0xf0] }
 0x564   : > { %v1267_v1 = vpop.f32.mrf.mxu3 }
 0x568   : > { %1343 = vadd.xlane.f32.xlu2 %v1342_v2 }
 0x56c   : > { %v1394_v3 = vpop.f32.mrf.mxu3 }
 0x56d   : > { %v1398_v4 = vmul.f32 0.17677669, %v1394_v3 }
 0x56f   : > { %v1399_v5 = vsel %vm1205_vm10, %v1398_v4, -inf }
 0x570   : > { %1400 = vmax.xlane.f32.xlu1 %v1399_v5  ;;  %v2598_v5 = vld [vmem:[%s3610_s0 + $0x64] sm:$0xf0] }
 0x574   : > { %v1396_v6 = vpop.f32.mrf.mxu3 }
 0x575   : > { %v2597_v6 = vld [vmem:[%s3610_s0 + $0x64] sm:$0xf] }
 0x5d3   : > { %v1272_v7 = vpop.xlane.xlu2 %1271 }
 0x5d4   : > { %v1273_v8 = vsub.f32 %v1269_v62, %v1272_v7  ;;  %v2476_v62 = vor.u32 %v2600_v60, %v2475_v59  ;;  %v2801_v60 = vld [vmem:[%s866_s16] ss:$0 sm:$0xff] }
 0x5d6   : > { %v1274_v9 = vmul.f32 1.442695, %v1273_v8  ;;  %v2469_v8 = vld [vmem:[%s3610_s0 + $0x68] sm:$0xf0] }
 0x5d8   : > { %2813 = vpow2.f32 %v1274_v9  ;;  %v2472_v9 = vor.u32 %v2597_v6, %v2469_v8 }
 0x5db   : > { %v1344_v16 = vpop.xlane.xlu2 %1343 }
 0x5de   : > { %v2814_v10 = vpop.eup %2813 }
 0x5df   : > { %v1276_v11 = vsel %vm1205_vm10, %v2814_v10, 0.0 }
 0x5e0   : > { %1277 = vadd.xlane.f32.xlu2 %v1276_v11  ;;  %v2596_v11 = vld [vmem:[%s3610_s0 + $0x54] sm:$0xf0] }
 0x5e3   : > { %v1401_v46 = vpop.xlane.xlu1 %1400 }
 0x5e4   : > { %v1402_v12 = vsub.f32 %v1398_v4, %v1401_v46  ;;  %v2467_v4 = vld [vmem:[%s3610_s0 + $0x60] sm:$0xf]  ;;  %v2595_v46 = vld [vmem:[%s3610_s0 + $0x54] sm:$0xf] }
 0x5e5   : > { %v2468_v7 = vor.u32 %v2598_v5, %v2467_v4  ;;  %v2615_v5 = vld [vmem:[%s3651_s13 + $0x70] sm:$0xff] }
 0x5e6   : > { %v1403_v13 = vmul.f32 1.442695, %v1402_v12 }
 0x5e8   : > { %2815 = vpow2.f32 %v1403_v13  ;;  %v2461_v13 = vld [vmem:[%s3610_s0 + $0x58] sm:$0xf0] }
 0x5e9   : > { %2817 = vrcp.f32 %v1344_v16  ;;  %v2594_v16 = vld [vmem:[%s3610_s0 + $0x44] sm:$0xf0] }
 0x5ee   : > { %v2816_v14 = vpop.eup %2815 }
 0x5ef   : > { %v1405_v15 = vsel %vm1205_vm10, %v2816_v14, 0.0  ;;  %v2818_v18 = vpop.eup %2817 }
 0x5f0   : > { %1406 = vadd.xlane.f32.xlu1 %v1405_v15  ;;  %v1346_v20 = vmul.f32 %v2818_v18, %v2812_v0  ;;  %v2480_v0 = vor.u32 %v2599_v61, %v2477_v63  ;;  %v2451_v15 = vld [vmem:[%s3610_s0 + $0x40] sm:$0xf] }
 0x5f1   : > { %v2452_v18 = vor.u32 %v2594_v16, %v2451_v15  ;;  %v2605_v15 = vld [vmem:[%s3651_s13 + $0x20] sm:$0xff] }
 0x5f2   : > { %v1347_v25 = vpack.c.bf16 %v1346_v20, %v1346_v20  ;;  %1669 = vmatpush.bf16.msra.mxu3 %v2480_v0  ;;  %v2608_v0 = vld [vmem:[%s3651_s13 + $0x38] sm:$0xff]  ;;  %v2613_v16 = vld [vmem:[%s3651_s13 + $0x60] sm:$0xff] }
 0x5f6   : > { %1670 = vmatpush.bf16.msra.mxu3 %v2472_v9 }
 0x5f8   : > { %1348 = vrot.lane.b32.xlu2 %v1284_v45, %s3277_s2 }
 0x609   : > { %1411 = vrot.lane.b32.xlu1 %v1284_v45, %s3279_s21  ;;  %v2579_v45 = vld [vmem:[%s3639_s5 + $0x10] sm:$0xff] }
 0x60a   : > { %1509 = vmatpush.bf16.msrb.mxu1 %v2579_v45  ;;  %v2421_v45 = vld [vmem:[%s3610_s0 + $0x8] sm:$0xf0] }
 0x60e   : > { %1510 = vmatpush.bf16.msrb.mxu1 %v2578_v47  ;;  %v2424_v47 = vor.u32 %v2585_v42, %v2421_v45  ;;  %v2610_v45 = vld [vmem:[%s3651_s13 + $0x48] sm:$0xff] }
 0x612   : > { %1511 = vmatpush.bf16.msrb.mxu1 %v2577_v48 }
 0x653   : > { %v1278_v17 = vpop.xlane.xlu2 %1277 }
 0x654   : > { %2819 = vrcp.f32 %v1278_v17  ;;  %v2593_v17 = vld [vmem:[%s3610_s0 + $0x44] sm:$0xf] }
 0x65a   : > { %v2820_v19 = vpop.eup %2819 }
 0x65b   : > { %v1280_v21 = vmul.f32 %v2820_v19, %v2814_v10  ;;  %v1349_v22 = vpop.permute.xlu2 %1348  ;;  %v2459_v10 = vld [vmem:[%s3610_s0 + $0x50] sm:$0xf]  ;;  %v2453_v19 = vld [vmem:[%s3610_s0 + $0x48] sm:$0xf0] }
 0x65c   : > { %v1354_v23 = vsel %vm1222_vm9, %v1349_v22, 0  ;;  %v2460_v12 = vor.u32 %v2596_v11, %v2459_v10  ;;  %v2456_v20 = vor.u32 %v2593_v17, %v2453_v19  ;;  %v2592_v22 = vld [vmem:[%s3610_s0 + $0x34] sm:$0xf0]  ;;  %v2606_v10 = vld [vmem:[%s3651_s13 + $0x28] sm:$0xff] }
 0x65d   : > { %1363 = vmatpush.bf16.msra.mxu2 %v1354_v23  ;;  %v1281_v24 = vpack.c.bf16 %v1280_v21, %v1280_v21  ;;  %v2443_v21 = vld [vmem:[%s3610_s0 + $0x30] sm:$0xf]  ;;  %v2591_v23 = vld [vmem:[%s3610_s0 + $0x34] sm:$0xf]  ;;  %v2614_v11 = vld [vmem:[%s3651_s13 + $0x68] sm:$0xff] }
 0x65f   : > { %2380 = vmatmul.msk.bf16.vlgmr.msrb.gmra.mxu0 %vm1205_vm10, %v1281_v24  ;;  %v2444_v24 = vor.u32 %v2592_v22, %v2443_v21 }
 0x660   : > { %2382 = vmatmul.msk.bf16.vlgmr.msra.gmra.mxu2 %vm1205_vm10, %v1347_v25  ;;  %v2445_v25 = vld [vmem:[%s3610_s0 + $0x38] sm:$0xf0] }
 0x661   : > { %1656 = vmatpush.bf16.msrb.mxu2 %v2476_v62 }
 0x663   : > { %v1407_v26 = vpop.xlane.xlu1 %1406 }
 0x664   : > { %2821 = vrcp.f32 %v1407_v26  ;;  %v2448_v26 = vor.u32 %v2591_v23, %v2445_v25  ;;  %v2604_v25 = vld [vmem:[%s3651_s13 + $0x18] sm:$0xff] }
 0x665   : > { %1657 = vmatpush.bf16.msrb.mxu2 %v2468_v7 }
 0x669   : > { %1658 = vmatpush.bf16.msrb.mxu2 %v2460_v12 }
 0x66a   : > { %v2822_v28 = vpop.eup %2821 }
 0x66b   : > { %v1409_v29 = vmul.f32 %v2822_v28, %v2816_v14  ;;  %v2464_v14 = vor.u32 %v2595_v46, %v2461_v13  ;;  %v2435_v28 = vld [vmem:[%s3610_s0 + $0x20] sm:$0xf] }
 0x66d   : > { %v1410_v32 = vpack.c.bf16 %v1409_v29, %v1409_v29  ;;  %1671 = vmatpush.bf16.msra.mxu3 %v2464_v14  ;;  %1659 = vmatpush.bf16.msrb.mxu2 %v2452_v18  ;;  %v2590_v29 = vld [vmem:[%s3610_s0 + $0x24] sm:$0xf0] }
 0x671   : > { %1672 = vmatpush.bf16.msra.mxu3 %v2456_v20  ;;  %1660 = vmatpush.bf16.msrb.mxu2 %v2444_v24 }
 0x675   : > { %1673 = vmatpush.bf16.msra.mxu3 %v2448_v26  ;;  %v2612_v26 = vld [vmem:[%s3651_s13 + $0x58] sm:$0xff] }
 0x67b   : > { %v1412_v30 = vpop.permute.xlu1 %1411 }
 0x67c   : > { %v1417_v31 = vsel %vm1222_vm9, %v1412_v30, 0  ;;  %v2589_v30 = vld [vmem:[%s3610_s0 + $0x24] sm:$0xf] }
 0x67d   : > { %1426 = vmatpush.bf16.msra.mxu0 %v1417_v31  ;;  %v2436_v31 = vor.u32 %v2590_v29, %v2435_v28 }
 0x67f   : > { %1661 = vmatpush.bf16.msrb.mxu2 %v2436_v31 }
 0x680   : > { %2384 = vmatmul.msk.bf16.vlgmr.msra.gmra.mxu0 %vm1205_vm10, %v1410_v32  ;;  %v2437_v32 = vld [vmem:[%s3610_s0 + $0x28] sm:$0xf0] }
 0x681   : > { %1900 = vmatpush.bf16.msrb.mxu0 %v2608_v0 }
 0x6dc   : > { %v1302_v33 = vpop.f32.mrf.mxu0 }
 0x6dd   : > { %1307 = vrot.lane.b32.xlu0 %v1302_v33, %s3279_s21  ;;  %v2440_v33 = vor.u32 %v2589_v30, %v2437_v32 }
 0x6df   : > { %1674 = vmatpush.bf16.msra.mxu3 %v2440_v33 }
 0x6e3   : > { %v1365_v34 = vpop.f32.mrf.mxu2 }
 0x6e4   : > { %v1304_v35 = vpop.f32.mrf.mxu0 }
 0x6e5   : > { %1370 = vrot.lane.b32.xlu0 %v1365_v34, %s3277_s2  ;;  %v2427_v34 = vld [vmem:[%s3610_s0 + $0x10] sm:$0xf]  ;;  %v2588_v35 = vld [vmem:[%s3610_s0 + $0x14] sm:$0xf0] }
 0x6e6   : > { %v2428_v37 = vor.u32 %v2588_v35, %v2427_v34  ;;  %v2603_v35 = vld [vmem:[%s3651_s13 + $0x10] sm:$0xff] }
 0x6e8   : > { %1662 = vmatpush.bf16.msrb.mxu2 %v2428_v37 }
 0x6eb   : > { %v1367_v38 = vpop.f32.mrf.mxu2 }
 0x6ec   : > { %v2429_v38 = vld [vmem:[%s3610_s0 + $0x18] sm:$0xf0] }
 0x6ed   : > { %v2432_v39 = vor.u32 %v2587_v36, %v2429_v38  ;;  %v2611_v36 = vld [vmem:[%s3651_s13 + $0x50] sm:$0xff] }
 0x6ef   : > { %1675 = vmatpush.bf16.msra.mxu3 %v2432_v39 }
 0x6f3   : > { %1676 = vmatpush.bf16.msra.mxu3 %v2424_v47 }
 0x6fd   : > { %v1428_v40 = vpop.f32.mrf.mxu0 }
 0x6fe   : > { %1433 = vrot.lane.b32.xlu2 %v1428_v40, %s3278_s29  ;;  %v2419_v40 = vld [vmem:[%s3610_s0] sm:$0xf] }
 0x705   : > { %v1430_v41 = vpop.f32.mrf.mxu0 }
 0x706   : > { %v2586_v41 = vld [vmem:[%s3610_s0 + $0x4] sm:$0xf0]  ;;  %s4095_s0 = scalar_lea.vmem [#allocation15], %s3593_s17 }
 0x707   : > { %v2420_v44 = vor.u32 %v2586_v41, %v2419_v40 }
 0x709   : > { %1663 = vmatpush.bf16.msrb.mxu2 %v2420_v44  ;;  %v2602_v44 = vld [vmem:[%s3651_s13 + $0x8] sm:$0xff] }
 0x74f   : > { %v1308_v49 = vpop.permute.xlu0 %1307 }
 0x750   : > { %1311 = vst.msk [vmem:[#allocation3] sm:$0xff] %vm1310_vm11, %v1308_v49 }
 0x757   : > { %v1371_v50 = vpop.permute.xlu0 %1370 }
 0x758   : > { %1374 = vst.msk [vmem:[#allocation3] sm:$0xff] %vm1373_vm12, %v1371_v50  ;;  %v1434_v51 = vpop.permute.xlu2 %1433 }
 0x759   : > { %1437 = vst.msk [vmem:[#allocation3] sm:$0xff] %vm1436_vm13, %v1434_v51 }
 0x760   : > { %v1438_v52 = vld [vmem:[#allocation3] sm:$0xff] }
 0x761   : > { %v1455_v53 = vpack.c.bf16 %v1438_v52, %v1438_v52 }
 0x763   : > { %1512 = vmatmul.bf16.vlgmr.msrb.gmra.mxu1 %v1455_v53 }
 0x7e0   : > { %v1513_v55 = vpop.f32.mrf.mxu1 }
 0x7e1   : > { %v1517_v56 = vadd.f32 %v1513_v55, %v3668_v27 }
 0x7e3   : > { %v3785_v57 = vadd.f32 %v2799_v54, %v1517_v56 }
 0x7e5   : > { %1525 = vadd.xlane.f32.xlu0 %v3785_v57 }
 0x7e8   : > { %v1515_v58 = vpop.f32.mrf.mxu1 }
 0x7e9   : > { %v2800_v58 = vld [vmem:[%s4095_s0] ss:$0 sm:$0xff] }
 0x858   : > { %v1526_v27 = vpop.xlane.xlu0 %1525 }
 0x859   : > { %v1527_v1 = vmul.f32 %v1526_v27, %v3677_v43  ;;  %v2616_v27 = vld [vmem:[%s3651_s13 + $0x78] sm:$0xff] }
 0x85a   : > { %1913 = vmatpush.bf16.msra.mxu1 %v2616_v27 }
 0x85b   : > { %v3794_v2 = vsub.f32 %v3785_v57, %v1527_v1  ;;  %v1570_v1 = vld [vmem:[%s3649_s3] sm:$0x3] }
 0x85c   : > { %v1573_v4 = vperm.slane %v1570_v1, 1 }
 0x85d   : > { %v1529_v3 = vmul.f32 %v3794_v2, %v3794_v2 }
 0x85e   : > { %1914 = vmatpush.bf16.msra.mxu1 %v2615_v5 }
 0x85f   : > { %1530 = vadd.xlane.f32.xlu1 %v1529_v3  ;;  %v1572_v3 = vperm.slane %v1570_v1, 0 }
 0x862   : > { %1915 = vmatpush.bf16.msra.mxu1 %v2614_v11 }
 0x866   : > { %1916 = vmatpush.bf16.msra.mxu1 %v2613_v16 }
 0x86a   : > { %1917 = vmatpush.bf16.msra.mxu1 %v2612_v26 }
 0x86e   : > { %1918 = vmatpush.bf16.msra.mxu1 %v2611_v36 }
 0x872   : > { %1919 = vmatpush.bf16.msra.mxu1 %v2610_v45 }
 0x8d2   : > { %v1531_v48 = vpop.xlane.xlu1 %1530 }
 0x8d3   : > { %v1532_v49 = vmul.f32 %v1531_v48, %v3677_v43 }
 0x8d5   : > { %v1533_v50 = vadd.f32 1e-05, %v1532_v49 }
 0x8d7   : > { %2823 = vrsqrt.f32 %v1533_v50  ;;  %vm1540_vm15 = vweird.f32 %v1533_v50 }
 0x8dd   : > { %v2824_v51 = vpop.eup %2823 }
 0x8de   : > { %v1535_v52 = vmul.f32 %v2824_v51, %v1533_v50  ;;  %vm1541_vm14 = vweird.f32 %v2824_v51 }
 0x8df   : > { %vm1542_vm0 = vmor %vm1540_vm15, %vm1541_vm14 }
 0x8e0   : > { %v1536_v53 = vmul.f32 %v2824_v51, %v1535_v52 }
 0x8e2   : > { %v1537_v54 = vmul.f32 0.5, %v1536_v53  ;;  %v2601_v53 = vld [vmem:[%s3651_s13] sm:$0xff] }
 0x8e4   : > { %v1538_v55 = vsub.f32 1.5, %v1537_v54  ;;  %v2609_v54 = vld [vmem:[%s3651_s13 + $0x40] sm:$0xff] }
 0x8e5   : > { %1920 = vmatpush.bf16.msra.mxu1 %v2609_v54 }
 0x8e6   : > { %v1539_v56 = vmul.f32 %v2824_v51, %v1538_v55 }
 0x8e8   : > { %v1543_v59 = vsel %vm1542_vm0, %v2824_v51, %v1539_v56 }
 0x8e9   : > { %v1544_v43 = vmul.f32 %v1543_v59, %v3794_v2  ;;  %v2607_v2 = vld [vmem:[%s3651_s13 + $0x30] sm:$0xff]  ;;  %s4098_s13 = sld [smem:[#allocation36_spill]] }
 0x8ea   : > { %1901 = vmatpush.bf16.msrb.mxu0 %v2607_v2 }
 0x8eb   : > { %v1548_v61 = vmul.f32 %v2800_v58, %v1544_v43 }
 0x8ed   : > { %v1552_v62 = vadd.f32 %v2801_v60, %v1548_v61 }
 0x8ee   : > { %1902 = vmatpush.bf16.msrb.mxu0 %v2606_v10 }
 0x8ef   : > { %v1569_v63 = vpack.c.bf16 %v1552_v62, %v1552_v62  ;;  %p2547_p6 = scmp.ne.s32.totalorder %s4098_s13, 1 }
 0x8f0   : > { %s4099_s11 = sld [smem:[#allocation49_spill]] (!%p2547_p6) }
 0x8f1   : > { %1664 = vmatmul.bf16.vlgmr.msrb.gmra.mxu2 %v1569_v63  ;;  %1677 = vmatmul.bf16.vlgmr.msra.gmra.mxu3 %v1569_v63 }
 0x8f2   : > { %1903 = vmatpush.bf16.msrb.mxu0 %v2605_v15 }
 0x8f6   : > { %1904 = vmatpush.bf16.msrb.mxu0 %v2604_v25 }
 0x8fa   : > { %1905 = vmatpush.bf16.msrb.mxu0 %v2603_v35 }
 0x8fe   : > { %1906 = vmatpush.bf16.msrb.mxu0 %v2602_v44 }
 0x902   : > { %1907 = vmatpush.bf16.msrb.mxu0 %v2601_v53 }
 0x974   : > { %v1665_v6 = vpop.f32.mrf.mxu2  ;;  %v1678_v7 = vpop.f32.mrf.mxu3 }
 0x975   : > { %v3840_v8 = vadd.f32 %v1665_v6, %v1572_v3  ;;  %v3842_v9 = vadd.f32 %v1678_v7, %v1573_v4 }
 0x977   : > { %v3847_v46 = vmul.f32 0.70710677, %v3840_v8  ;;  %v3850_v12 = vmul.f32 0.70710677, %v3842_v9 }
 0x979   : > { %v1686_v13 = vmul.f32 %v3847_v46, %v3847_v46  ;;  %v1726_v14 = vmul.f32 %v3850_v12, %v3850_v12 }
 0x97b   : > { %v1687_v17 = vmin.f32 %v1686_v13, 16.0  ;;  %v3858_v18 = vmin.f32 %v1726_v14, 16.0 }
 0x97c   : > { %v1667_v19 = vpop.f32.mrf.mxu2  ;;  %v1680_v20 = vpop.f32.mrf.mxu3 }
 0x97d   : > { %v1688_v21 = vmul.f32 2.1237322e-06, %v1687_v17  ;;  %v1699_v22 = vmul.f32 3.8918573e-05, %v1687_v17  ;;  %v1728_v23 = vmul.f32 2.1237322e-06, %v3858_v18 }
 0x97e   : > { %v1739_v24 = vmul.f32 3.8918573e-05, %v3858_v18 }
 0x97f   : > { %v1689_v28 = vadd.f32 0.00028619796, %v1688_v21  ;;  %v1700_v29 = vadd.f32 0.001143296, %v1699_v22  ;;  %v1729_v30 = vadd.f32 0.00028619796, %v1728_v23 }
 0x980   : > { %v1740_v31 = vadd.f32 0.001143296, %v1739_v24 }
 0x981   : > { %v1690_v32 = vmul.f32 %v1689_v28, %v1687_v17  ;;  %v1701_v33 = vmul.f32 %v1700_v29, %v1687_v17  ;;  %v1730_v34 = vmul.f32 %v1729_v30, %v3858_v18 }
 0x982   : > { %v1741_v37 = vmul.f32 %v1740_v31, %v3858_v18 }
 0x983   : > { %v1691_v38 = vadd.f32 0.0036580483, %v1690_v32  ;;  %v1702_v39 = vadd.f32 0.014752088, %v1701_v33  ;;  %v1731_v42 = vadd.f32 0.0036580483, %v1730_v34 }
 0x984   : > { %v1742_v40 = vadd.f32 0.014752088, %v1741_v37  ;;  %v1682_v37 = vmul.f32 0.5, %v3840_v8 }
 0x985   : > { %v1703_v41 = vmul.f32 %v1702_v39, %v1687_v17  ;;  %v1692_v48 = vmul.f32 %v1691_v38, %v1687_v17  ;;  %v1732_v52 = vmul.f32 %v1731_v42, %v3858_v18 }
 0x986   : > { %v1743_v47 = vmul.f32 %v1742_v40, %v3858_v18 }
 0x987   : > { %v1704_v49 = vadd.f32 0.112945676, %v1703_v41  ;;  %v1693_v56 = vadd.f32 0.05243302, %v1692_v48  ;;  %v1733_v60 = vadd.f32 0.05243302, %v1732_v52 }
 0x988   : > { %v1744_v50 = vadd.f32 0.112945676, %v1743_v47  ;;  %v2802_v48 = vld [vmem:[%s873_s24] ss:$0 sm:$0xff] }
 0x989   : > { %v1705_v51 = vmul.f32 %v1704_v49, %v1687_v17  ;;  %v1694_v62 = vmul.f32 %v1693_v56, %v1687_v17  ;;  %v1734_v27 = vmul.f32 %v1733_v60, %v3858_v18 }
 0x98a   : > { %v1745_v55 = vmul.f32 %v1744_v50, %v3858_v18 }
 0x98b   : > { %v1706_v58 = vadd.f32 0.4994258, %v1705_v51  ;;  %v1695_v1 = vadd.f32 0.18741608, %v1694_v62  ;;  %v1735_v3 = vadd.f32 0.18741608, %v1734_v27 }
 0x98c   : > { %v1746_v59 = vadd.f32 0.4994258, %v1745_v55 }
 0x98d   : > { %v1707_v43 = vmul.f32 %v1706_v58, %v1687_v17  ;;  %v1696_v2 = vmul.f32 %v1695_v1, %v1687_v17  ;;  %v1736_v7 = vmul.f32 %v1735_v3, %v3858_v18 }
 0x98e   : > { %v1747_v61 = vmul.f32 %v1746_v59, %v3858_v18 }
 0x98f   : > { %v1708_v63 = vadd.f32 1.0, %v1707_v43  ;;  %v1697_v13 = vadd.f32 1.1283791, %v1696_v2  ;;  %v1737_v21 = vadd.f32 1.1283791, %v1736_v7 }
 0x990   : > { %v1748_v0 = vadd.f32 1.0, %v1747_v61 }
 0x991   : > { %2825 = vrcp.f32 %v1708_v63  ;;  %v1720_v14 = vand.u32 2147483648, %v1708_v63  ;;  %v1718_v19 = vand.u32 2147483647, %v1708_v63  ;;  %vm1714_vm3 = vweird.f32 %v1708_v63 }
 0x992   : > { %2827 = vrcp.f32 %v1748_v0  ;;  %v1760_v20 = vand.u32 2147483648, %v1748_v0  ;;  %v1758_v23 = vand.u32 2147483647, %v1748_v0  ;;  %vm1754_vm5 = vweird.f32 %v1748_v0 }
 0x993   : > { %v1721_v17 = vor.u32 1.1754944e-38, %v1720_v14  ;;  %v1698_v18 = vmul.f32 %v1697_v13, %v3847_v46  ;;  %vm1719_vm6 = vcmp.eq.f32.partialorder %v1718_v19, 8.507059e+37  ;;  %v1738_v30 = vmul.f32 %v1737_v21, %v3850_v12 }
 0x994   : > { %v1761_v28 = vor.u32 1.1754944e-38, %v1760_v20  ;;  %vm1759_vm8 = vcmp.eq.f32.partialorder %v1758_v23, 8.507059e+37  ;;  %v1683_v46 = vmul.f32 0.5, %v3842_v9 }
 0x997   : > { %v2826_v4 = vpop.eup %2825 }
 0x998   : > { %v2828_v5 = vpop.eup %2827  ;;  %v1710_v6 = vmul.f32 %v2826_v4, %v1708_v63  ;;  %vm1715_vm1 = vweird.f32 %v2826_v4 }
 0x999   : > { %v1750_v10 = vmul.f32 %v2828_v5, %v1748_v0  ;;  %vm1755_vm2 = vweird.f32 %v2828_v5  ;;  %vm1716_vm4 = vmor %vm1714_vm3, %vm1715_vm1 }
 0x99a   : > { %v1711_v11 = vsub.f32 1.0, %v1710_v6  ;;  %vm1756_vm7 = vmor %vm1754_vm5, %vm1755_vm2 }
 0x99b   : > { %v1751_v15 = vsub.f32 1.0, %v1750_v10 }
 0x99c   : > { %v1712_v16 = vmul.f32 %v2826_v4, %v1711_v11 }
 0x99d   : > { %v1752_v22 = vmul.f32 %v2828_v5, %v1751_v15 }
 0x99e   : > { %v1713_v24 = vadd.f32 %v2826_v4, %v1712_v16 }
 0x99f   : > { %v1753_v25 = vadd.f32 %v2828_v5, %v1752_v22 }
 0x9a0   : > { %v1717_v26 = vsel %vm1716_vm4, %v2826_v4, %v1713_v24 }
 0x9a1   : > { %v1722_v29 = vsel %vm1719_vm6, %v1721_v17, %v1717_v26  ;;  %v1757_v31 = vsel %vm1756_vm7, %v2828_v5, %v1753_v25 }
 0x9a2   : > { %v1723_v32 = vmul.f32 %v1722_v29, %v1698_v18  ;;  %v1762_v33 = vsel %vm1759_vm8, %v1761_v28, %v1757_v31 }
 0x9a3   : > { %v1763_v34 = vmul.f32 %v1762_v33, %v1738_v30 }
 0x9a4   : > { %v2481_v35 = vclamps-f32 %v1723_v32, 1.0 }
 0x9a5   : > { %v2482_v36 = vclamps-f32 %v1763_v34, 1.0 }
 0x9a6   : > { %v1766_v38 = vadd.f32 1.0, %v2481_v35 }
 0x9a7   : > { %v1767_v39 = vadd.f32 1.0, %v2482_v36 }
 0x9a8   : > { %v1768_v40 = vmul.f32 %v1766_v38, %v1682_v37 }
 0x9a9   : > { %v1769_v41 = vmul.f32 %v1767_v39, %v1683_v46 }
 0x9aa   : > { %v1802_v42 = vpack.c.bf16 %v1768_v40, %v1768_v40 }
 0x9ab   : > { %v1803_v44 = vpack.c.bf16 %v1769_v41, %v1769_v41 }
 0x9ac   : > { %1908 = vmatmul.bf16.vlgmr.msrb.gmra.mxu0 %v1802_v42 }
 0x9ad   : > { %1921 = vmatmul.bf16.vlgmr.msra.gmra.mxu1 %v1803_v44 }
 0xa29   : > { %v1909_v12 = vpop.f32.mrf.mxu0 }
 0xa2a   : > { %v1922_v45 = vpop.f32.mrf.mxu1 }
 0xa2b   : > { %v1923_v47 = vadd.f32 %v1922_v45, %v1909_v12 }
 0xa2d   : > { %v1926_v8 = vadd.f32 %v1923_v47, %v3785_v57 }
 0xa2e   : > { %1936 = sbr.rel (%p2547_p6) target bundleno = 2772 (0xad4), region = 133 }
 0xa2f   : > { %v1931_v49 = vadd.f32 %v2802_v48, %v1926_v8 }
 0xa31   : > { %1932 = vst [vmem:[#allocation2] sm:$0xff] %v1931_v49  ;;  %v1911_v9 = vpop.f32.mrf.mxu0 }
 0xa32   : > { %v1924_v50 = vpop.f32.mrf.mxu1 }
 0xa33   : > { %v1952_v51 = vld [vmem:[%s4099_s11 + $0x78] sm:$0xff]  ;;  %v1951_v52 = vld [vmem:[%s4099_s11 + $0x70] sm:$0xff]  ;;  %v1950_v57 = vld [vmem:[%s4099_s11 + $0x68] sm:$0xff]  ;;  %vm1974_vm9 = vcmask 16384  }
 0xa34   : > { %1954 = vmatpush.msra.mxu0 %v1952_v51  ;;  %v1949_v53 = vld [vmem:[%s4099_s11 + $0x60] sm:$0xff]  ;;  %v1948_v54 = vld [vmem:[%s4099_s11 + $0x58] sm:$0xff]  ;;  %v1947_v55 = vld [vmem:[%s4099_s11 + $0x50] sm:$0xff] }
 0xa35   : > { %v1946_v56 = vld [vmem:[%s4099_s11 + $0x48] sm:$0xff]  ;;  %v1945_v58 = vld [vmem:[%s4099_s11 + $0x40] sm:$0xff]  ;;  %v1944_v59 = vld [vmem:[%s4099_s11 + $0x38] sm:$0xff] }
 0xa36   : > { %1955 = vmatpush.msra.mxu0 %v1951_v52  ;;  %v1943_v43 = vld [vmem:[%s4099_s11 + $0x30] sm:$0xff]  ;;  %v1942_v60 = vld [vmem:[%s4099_s11 + $0x28] sm:$0xff]  ;;  %v1941_v61 = vld [vmem:[%s4099_s11 + $0x20] sm:$0xff] }
 0xa37   : > { %v1940_v62 = vld [vmem:[%s4099_s11 + $0x18] sm:$0xff]  ;;  %v1939_v63 = vld [vmem:[%s4099_s11 + $0x10] sm:$0xff]  ;;  %v1938_v0 = vld [vmem:[%s4099_s11 + $0x8] sm:$0xff] }
 0xa38   : > { %1956 = vmatpush.msra.mxu0 %v1950_v57  ;;  %v1937_v27 = vld [vmem:[%s4099_s11] sm:$0xff]  ;;  %v1953_v1 = vld [vmem:[#allocation9] sm:$0x1] }
 0xa3a   : > { %1957 = vmatpush.msra.mxu0 %v1949_v53 }
 0xa3c   : > { %1958 = vmatpush.msra.mxu0 %v1948_v54 }
 0xa3e   : > { %1959 = vmatpush.msra.mxu0 %v1947_v55 }
 0xa40   : > { %1960 = vmatpush.msra.mxu0 %v1946_v56 }
 0xa42   : > { %1961 = vmatpush.msra.mxu0 %v1945_v58 }
 0xa44   : > { %1962 = vmatpush.msra.mxu0 %v1944_v59 }
 0xa46   : > { %1963 = vmatpush.msra.mxu0 %v1943_v43 }
 0xa48   : > { %1964 = vmatpush.msra.mxu0 %v1942_v60 }
 0xa4a   : > { %1965 = vmatpush.msra.mxu0 %v1941_v61 }
 0xa4c   : > { %1966 = vmatpush.msra.mxu0 %v1940_v62 }
 0xa4e   : > { %1967 = vmatpush.msra.mxu0 %v1939_v63 }
 0xa50   : > { %1968 = vmatpush.msra.mxu0 %v1938_v0 }
 0xa52   : > { %1969 = vmatpush.msra.mxu0 %v1937_v27 }
 0xa53   : > { %1970 = vmatmul.f32.vlgmr.msra.gmra.mxu0 %v1931_v49 }
 0xad0   : > { %v1971_v3 = vpop.f32.mrf.mxu0 }
 0xad1   : > { %v1972_v4 = vadd.f32 %v1971_v3, %v1953_v1 }
 0xad3   : > { %1975 = vst.msk [vmem:[%s3655_s23] sm:$0x1] %vm1974_vm9, %v1972_v4 }
 0xad4 PF: > { %s4100_s20 = sld [smem:[#allocation37_spill]]  ;;  %s1987_s2 = sshll.u32 %s3655_s23, 4  ;;  %s1988_s2 = int_to_ptr.vmem [resolvable:$true] %s1987_s2 }
 0xad5   : > { %s4101_s26 = sld [smem:[#allocation63_spill]] }
 0xad6   : > { %s4103_s1 = sld [smem:[#allocation33_spill]] }
 0xadb   : > { %s4102_s22 = smov %s4101_s26  ;;  %s1985_s30 = scalar_lea.hbm %s4101_s26, %s4100_s20 }
 0xadc   : > { %s1989_s29 = sshll.u32 %s1985_s30, 4  ;;  %s4105_s21 = sand.u32 1, %s4103_s1   ;;  %s1990_s29 = int_to_ptr.hbm [resolvable:$true] %s1989_s29 }
 0xadd   : > { %s1977_s4 = scalar_lea.sflag [#allocation6], %s4105_s21  ;;  %s3137_s0 = sshra.s32 %s1990_s29, 4  ;;  %s3138_s0 = int_to_ptr.hbm [resolvable:$true] %s3137_s0 }
 0xade   : > { %s3139_s5 = scalar_lea.hbm %s3138_s0, 1  ;;  %s3143_s17 = scalar_lea.hbm %s4102_s22, 2 }
 0xadf   : > { %p3140_p8 = scmp.ne.s32.totalorder %s3138_s0, %s3139_s5  ;;  %p3144_p0 = scmp.lt.s32.totalorder %s3138_s0, %s4102_s22 }
 0xae0   : > { %p3145_p1 = scmp.lt.s32.totalorder %s3143_s17, %s3139_s5 }
 0xae1   : > { %p3141_p10 = pnand %p3140_p8, %p3441_p7 }
 0xae2   : > { %p3146_p3 = por %p3145_p1, %p3144_p0 }
 0xae3   : > { %p3142_p12 = pneg %p3141_p10 }
 0xae5   : > { %p3147_p11 = pnand %p3146_p3, %p3142_p12 }
 0xae7   : > { %3150 = shalt.err (!%p3147_p11)
}
 0xae8   : > { %2645 = dma.vmem_to_hbm [thread:$0]  (%p3441_p7), %s1988_s2, 16, %s1990_s29, %s1977_s4  }
 0xae9 PF: > { %s4106_s23 = sld [smem:[#allocation39_spill]] }
 0xaea   : > { %s4107_s13 = sld [smem:[#allocation32_spill]] }
 0xaef   : > { %p2687_p13 = scmp.ge.s32.totalorder %s4106_s23, 2 }
 0xaf0   : > { %s2001_s7 = sand.u32 1, %s4107_s13  }
 0xaf1   : > { %p2677_p2 = pnand %p2687_p13, %p3446_p9  ;;  %s2002_s15 = scalar_lea.sflag [#allocation6], %s2001_s7 }
 0xaf3   : > { %p2678_p4 = pneg %p2677_p2 }
 0xaf5   : > { %3218 = dma.done.wait (%p2678_p4), %s2002_s15, 16  }
 0xaf6   : > { %3220 = vsyncadd (%p2678_p4), %s2002_s15, 4294967280  ;;  %s41_s1 = sadd.s32 1, %s4106_s23   ;;  %s4109_s24 = sld [smem:[#allocation33_spill]] }
 0xaf7   : > { %p38_p5 = scmp.ge.s32.totalorder %s41_s1, 6   ;;  %s4110_s25 = sld [smem:[#allocation34_spill]] }
 0xaf8   : > { %s4111_s26 = sld [smem:[#allocation45_spill]]  ;;  %s4117_s27 = smov %s3239_s28 }
 0xaf9   : > { %s4112_s14 = sld [smem:[#allocation35_spill]]  ;;  %s4119_s0 = smov %s3255_s18 }
 0xafa   : > { %s4113_s29 = sld [smem:[#allocation44_spill]] }
 0xafb   : > { %s4114_s30 = sld [smem:[#allocation38_spill]] }
 0xafc   : > { %s4115_s9 = sld [smem:[#allocation42_spill]] }
 0xafd   : > { %s4116_s19 = sld [smem:[#allocation43_spill]] }
 0xafe   :  { %40 = sbr.rel (!%p38_p5) target bundleno = 34 (0x22), region = 233 }
 0xaff   : > { %s4118_s28 = smov %s4112_s14 }
 0xb02   : > { %s4120_s18 = smov %s4115_s9 }
 0xb03   :  { %2007 = vsyncpa [#allocation5], 1 }
 0xb04   :  { %2009 = vsyncpa [#allocation5 + $0x1], 1 }
 0xb05   :  { %2010 = vsyncpa [#allocation8], 1 }
 0xb06   :  { %2011 = vsyncpa [#allocation11], 1 }
 0xb07   :  { %2013 = vsyncpa [#allocation11 + $0x1], 1 }
 0xb08   :  { %2014 = vsyncpa [#allocation14], 1 }
 0xb09   :  { %2016 = vsyncpa [#allocation14 + $0x1], 1 }
 0xb0a   :  { %2017 = vsyncpa [#allocation17], 1 }
 0xb0b   :  { %2019 = vsyncpa [#allocation17 + $0x1], 1 }
 0xb0c   :  { %2020 = vsyncpa [#allocation6], 1 }
 0xb0d   :  { %2022 = vsyncpa [#allocation6 + $0x1], 1 }

</bundles_post_ra>
